<compile_context>
chip_gen: v7x
topology: tpu7x:2x2x1
jax: 0.10.0
libtpu: 0.0.40
codegen_flags: <defaults>
</compile_context>

<pallas_src>
import functools

import jax
import jax.numpy as jnp
from jax import lax
from jax.experimental import pallas as pl
from jax.experimental.pallas import tpu as pltpu


def _instance_norm(t, eps=1e-5):
    """Per-channel InstanceNorm (affine=False) on a (C, L) f32 slab.

    Two-pass (mean, then centered sum of squares) for numerical robustness
    now that bf16 MXU operands are the default.
    """
    inv_n = 1.0 / t.shape[1]
    mu = jnp.sum(t, axis=1, keepdims=True) * inv_n
    d = t - mu
    var = jnp.sum(d * d, axis=1, keepdims=True) * inv_n
    return d * lax.rsqrt(var + eps)


def _conv3x3_reflect(t, w_fused, bias, masks, W, compute_dtype):
    """3x3 conv with ReflectionPad2d(1) on a lane-dense flattened image.

    t:        (Ci, L) activation, L = H*W, in the shift/select dtype.
    w_fused:  (Co, 9*Ci) weights; tap k = ky*3 + kx occupies columns
              [k*Ci, (k+1)*Ci) and samples spatial offset (ky-1, kx-1).
    bias:     (Co, L) f32, lane-broadcast hoisted by the caller.
    masks:    (row0, rowL, col0, colL), each (Ci, L) bool.

    The 9 shifted taps are stacked along sublanes and contracted in a single
    K = 9*Ci MXU matmul, so tap accumulation stays inside the MXU.
    """
    row0, rowL, col0, colL = masks
    L = t.shape[1]

    def rl(v, s):  # roll toward higher flat index: out[i] = in[i - s]
        s = s % L
        return v if s == 0 else pltpu.roll(v, s, axis=1)

    # Row taps: sample row y+dy, reflected at the top/bottom edge.
    r_m1 = rl(t, W)          # row y-1 (wrong at row 0; fixed by mask)
    r_p1 = rl(t, L - W)      # row y+1 (wrong at row H-1; fixed by mask)
    rows = (
        jnp.where(row0, r_p1, r_m1),   # dy = -1 : row 0 reflects to row 1
        t,                             # dy =  0
        jnp.where(rowL, r_m1, r_p1),   # dy = +1 : row H-1 reflects to H-2
    )

    taps = []
    for r in rows:
        c_m1 = rl(r, 1)      # col x-1 (wrong at col 0; fixed by mask)
        c_p1 = rl(r, L - 1)  # col x+1 (wrong at col W-1; fixed by mask)
        taps.append(jnp.where(col0, c_p1, c_m1))   # dx = -1
        taps.append(r)                             # dx =  0
        taps.append(jnp.where(colL, c_m1, c_p1))   # dx = +1

    stacked = jnp.concatenate(taps, axis=0).astype(compute_dtype)   # (9*Ci, L)
    return jnp.dot(w_fused, stacked,
                   preferred_element_type=jnp.float32) + bias


def _resnet_block_kernel(x_ref, rc_ref, w1_ref, b1_ref, w2_ref, b2_ref, o_ref,
                         *, H, W, compute_dtype, shift_dtype):
    Nb, C, L = x_ref.shape

    # Exact integer edge masks from the precomputed (row, col) index table,
    # computed + broadcast once per grid step.
    rc = rc_ref[...]                      # (2, L) int32
    row = rc[0:1, :]
    col = rc[1:2, :]
    row0 = jnp.broadcast_to(row == 0, (C, L))
    rowL = jnp.broadcast_to(row == H - 1, (C, L))
    col0 = jnp.broadcast_to(col == 0, (C, L))
    colL = jnp.broadcast_to(col == W - 1, (C, L))
    masks = (row0, rowL, col0, colL)

    # Grid-invariant operands, loaded / broadcast once per grid step
    # (hoisted out of the per-image unroll).
    w1 = w1_ref[...]                      # (C, 9C) compute_dtype
    w2 = w2_ref[...]
    b1 = jnp.broadcast_to(b1_ref[...].astype(jnp.float32), (C, L))
    b2 = jnp.broadcast_to(b2_ref[...].astype(jnp.float32), (C, L))

    for nb in range(Nb):                  # small static unroll (gated in wrapper)
        x = x_ref[nb]                     # (C, L) lane-dense load
        h = _conv3x3_reflect(x.astype(shift_dtype), w1, b1, masks, W,
                             compute_dtype)
        h = _instance_norm(h)
        h = jnp.maximum(h, 0.0)           # ReLU
        # TODO(synk): training-mode Dropout(0.5) would go here.
        h = _conv3x3_reflect(h.astype(shift_dtype), w2, b2, masks, W,
                             compute_dtype)
        h = _instance_norm(h)
        o_ref[nb] = (x.astype(jnp.float32) + h).astype(o_ref.dtype)


def _vmem_limit_bytes():
    # Generation-aware VMEM budget: ~75% of per-core physical VMEM
    # (v5e/v6e: 128 MiB -> 96 MiB; v7x: 64 MiB -> 48 MiB).
    try:
        cap = int(pltpu.get_tpu_info().vmem_capacity_bytes)
    except Exception:
        cap = 64 * 1024 * 1024
    return (cap * 3) // 4


def resnet_block(x, w1, b1, w2, b2, *, compute_dtype=jnp.bfloat16,
                 shift_dtype=None, batch_block=None):
    """x: (N, C, H, W); w*: (C, C, 3, 3); b*: (C,).  Returns (N, C, H, W).

    compute_dtype: MXU operand dtype (accumulation is always f32).  bfloat16
      is the right default on v6e/v7x and avoids f32 multi-pass MXU emulation
      on v5e.
    shift_dtype: dtype of the pre-MXU roll/select path.  Defaults to
      compute_dtype; pass jnp.float32 on v5e (its VPU has no native bf16).
    """
    N, C, H, W = x.shape
    assert H >= 2 and W >= 2, "ReflectionPad2d(1) needs H, W >= 2"
    L = H * W
    if shift_dtype is None:
        shift_dtype = compute_dtype

    # Lane-dense layout: flatten spatial dims onto the lane axis.
    x_flat = x.reshape(N, C, L)

    # Exact (row, col) index table used for the reflection-edge masks.
    rows = jnp.broadcast_to(jnp.arange(H, dtype=jnp.int32)[:, None], (H, W))
    cols = jnp.broadcast_to(jnp.arange(W, dtype=jnp.int32)[None, :], (H, W))
    rc = jnp.stack([rows.reshape(L), cols.reshape(L)], axis=0)      # (2, L)

    # (Co, Ci, 3, 3) -> (Co, 9*Ci): tap k = ky*3+kx occupies columns
    # [k*Ci, (k+1)*Ci), matching the sublane-stacked taps in the kernel.
    def fuse_w(w):
        return jnp.transpose(w, (0, 2, 3, 1)).reshape(C, 9 * C).astype(compute_dtype)
    w1f, w2f = fuse_w(w1), fuse_w(w2)

    # Narrow (C, 1) biases; the lane broadcast happens once inside the kernel.
    b1c = b1.astype(jnp.float32).reshape(C, 1)
    b2c = b2.astype(jnp.float32).reshape(C, 1)

    per_image_bytes = C * L * 4
    if batch_block is None:
        # In-kernel batch unrolling only pays in the tiny-image regime
        # (amortizes the ~0.35 us/grid-step overhead).  Keep >= 2 grid steps
        # so the "parallel" batch axis can feed both v7x TensorCores.
        batch_block = 1
        if N >= 2 and per_image_bytes <= (1 << 20):
            batch_block = max(1, min(8, N // 2,
                                     (2 << 20) // max(per_image_bytes, 1)))
            while N % batch_block:
                batch_block -= 1
    assert N % batch_block == 0, "batch_block must divide N"
    grid = (N // batch_block,)

    kernel = functools.partial(_resnet_block_kernel, H=H, W=W,
                               compute_dtype=compute_dtype,
                               shift_dtype=shift_dtype)

    w_bytes = 2 * C * 9 * C * jnp.dtype(compute_dtype).itemsize
    cost = pl.CostEstimate(
        flops=2 * N * 2 * 9 * C * C * L,
        transcendentals=2 * N * C,
        bytes_accessed=2 * N * C * L * x.dtype.itemsize + w_bytes
                       + 2 * C * 4 + 2 * L * 4,
    )

    def build_and_call(single_buffer_consts):
        def const_spec(shape):
            index_map = lambda n, _nd=len(shape): (0,) * _nd
            if single_buffer_consts:
                # Grid-invariant operand: no point double-buffering it.
                return pl.BlockSpec(shape, index_map,
                                    pipeline_mode=pl.Buffered(1))
            return pl.BlockSpec(shape, index_map)

        return pl.pallas_call(
            kernel,
            out_shape=jax.ShapeDtypeStruct((N, C, L), x.dtype),
            grid_spec=pltpu.PrefetchScalarGridSpec(
                num_scalar_prefetch=0,
                grid=grid,
                in_specs=[
                    pl.BlockSpec((batch_block, C, L), lambda n: (n, 0, 0)),
                    const_spec((2, L)),        # row/col index table
                    const_spec((C, 9 * C)),    # conv1 weights (fused taps)
                    const_spec((C, 1)),        # conv1 bias
                    const_spec((C, 9 * C)),    # conv2 weights (fused taps)
                    const_spec((C, 1)),        # conv2 bias
                ],
                out_specs=pl.BlockSpec((batch_block, C, L),
                                       lambda n: (n, 0, 0)),
            ),
            compiler_params=pltpu.CompilerParams(
                dimension_semantics=("parallel",),
                vmem_limit_bytes=_vmem_limit_bytes(),
            ),
            cost_estimate=cost,
        )(x_flat, rc, w1f, b1c, w2f, b2c)

    try:
        out = build_and_call(True)
    except Exception:
        # Fallback for JAX builds without BlockSpec pipeline_mode /
        # pl.Buffered(1): constants fall back to default double buffering.
        out = build_and_call(False)
    return out.reshape(N, C, H, W)


def resnet_block_reference(x, w1, b1, w2, b2, eps=1e-5):
    # Pure-JAX reference (NCHW) for a sanity check.
    def conv(t, w, b):
        tp = jnp.pad(t, ((0, 0), (0, 0), (1, 1), (1, 1)), mode="reflect")
        y = lax.conv_general_dilated(
            tp, w, window_strides=(1, 1), padding="VALID",
            dimension_numbers=("NCHW", "OIHW", "NCHW"))
        return y + b[None, :, None, None]

    def inorm(t):
        mu = jnp.mean(t, axis=(2, 3), keepdims=True)
        var = jnp.mean((t - mu) ** 2, axis=(2, 3), keepdims=True)
        return (t - mu) * lax.rsqrt(var + eps)

    h = jax.nn.relu(inorm(conv(x, w1, b1)))
    h = inorm(conv(h, w2, b2))
    return x + h


if __name__ == "__main__":
    key = jax.random.PRNGKey(0)
    N, C, H, W = 2, 4, 16, 16

    kx, kw1, kb1, kw2, kb2 = jax.random.split(key, 5)
    x = jax.random.normal(kx, (N, C, H, W), dtype=jnp.float32)
    # Deterministic synthetic params (Conv2d(C, C, 3, bias=True) x 2).
    fan_in = C * 3 * 3
    bound = 1.0 / jnp.sqrt(fan_in)
    w1 = jax.random.uniform(kw1, (C, C, 3, 3), jnp.float32, -bound, bound)
    b1 = jax.random.uniform(kb1, (C,), jnp.float32, -bound, bound)
    w2 = jax.random.uniform(kw2, (C, C, 3, 3), jnp.float32, -bound, bound)
    b2 = jax.random.uniform(kb2, (C,), jnp.float32, -bound, bound)

    ref = jax.block_until_ready(resnet_block_reference(x, w1, b1, w2, b2))

    # Exact-precision path (f32 MXU operands): must match the reference.
    out_f32 = jax.block_until_ready(
        resnet_block(x, w1, b1, w2, b2, compute_dtype=jnp.float32))
    assert out_f32.shape == (N, C, H, W) and out_f32.dtype == x.dtype
    err = float(jnp.max(jnp.abs(out_f32 - ref)))
    assert err < 1e-4, f"f32 mismatch vs reference: {err}"

    # Batched-unroll path (2 images per grid step).
    out_bb = jax.block_until_ready(
        resnet_block(x, w1, b1, w2, b2, compute_dtype=jnp.float32,
                     batch_block=2))
    err_bb = float(jnp.max(jnp.abs(out_bb - ref)))
    assert err_bb < 1e-4, f"batch_block=2 mismatch vs reference: {err_bb}"

    # Default path: bf16 MXU operands, f32 accumulation / norm / residual.
    out_bf16 = jax.block_until_ready(resnet_block(x, w1, b1, w2, b2))
    err_bf16 = float(jnp.max(jnp.abs(out_bf16 - ref)))
    assert err_bf16 < 0.3, f"bf16 path too far from reference: {err_bf16}"

    print("KERNEL_OK")
</pallas_src>

<mosaic_0001>
module attributes {stable_mosaic.version = 11 : i64} {
  func.func @_resnet_block_kernel(%arg0: i32, %arg1: memref<1x4x256xf32, #tpu.memory_space<vmem>>, %arg2: memref<2x256xi32, #tpu.memory_space<vmem>>, %arg3: memref<4x36xf32, #tpu.memory_space<vmem>>, %arg4: memref<4x1xf32, #tpu.memory_space<vmem>>, %arg5: memref<4x36xf32, #tpu.memory_space<vmem>>, %arg6: memref<4x1xf32, #tpu.memory_space<vmem>>, %arg7: memref<1x4x256xf32, #tpu.memory_space<vmem>>) attributes {dimension_semantics = [#tpu.dimension_semantics<parallel>], iteration_bounds = array<i64: 2>, scalar_prefetch = 0 : i64, scratch_operands = 0 : i64, tpu.core_type = #tpu.core_type<tc>, window_params = [{transform_indices = @transform_0, window_bounds = array<i64: 1, 4, 256>}, {pipeline_mode = #tpu.pipeline_mode<synchronous>, transform_indices = @transform_1, window_bounds = array<i64: 2, 256>}, {pipeline_mode = #tpu.pipeline_mode<synchronous>, transform_indices = @transform_2, window_bounds = array<i64: 4, 36>}, {pipeline_mode = #tpu.pipeline_mode<synchronous>, transform_indices = @transform_3, window_bounds = array<i64: 4, 1>}, {pipeline_mode = #tpu.pipeline_mode<synchronous>, transform_indices = @transform_4, window_bounds = array<i64: 4, 36>}, {pipeline_mode = #tpu.pipeline_mode<synchronous>, transform_indices = @transform_5, window_bounds = array<i64: 4, 1>}, {transform_indices = @transform_6, window_bounds = array<i64: 1, 4, 256>}]} {
    %c0 = arith.constant 0 : index
    %c0_0 = arith.constant 0 : index
    %0 = vector.load %arg2[%c0, %c0_0] : memref<2x256xi32, #tpu.memory_space<vmem>>, vector<2x256xi32>
    %1 = vector.extract_strided_slice %0 {offsets = [0, 0], sizes = [1, 256], strides = [1, 1]} : vector<2x256xi32> to vector<1x256xi32>
    %2 = vector.extract_strided_slice %0 {offsets = [1, 0], sizes = [1, 256], strides = [1, 1]} : vector<2x256xi32> to vector<1x256xi32>
    %c0_i32 = arith.constant 0 : i32
    %3 = vector.broadcast %c0_i32 : i32 to vector<1x256xi32>
    %4 = arith.cmpi eq, %1, %3 : vector<1x256xi32>
    %5 = vector.shape_cast %4 : vector<1x256xi1> to vector<1x256xi1>
    %6 = vector.broadcast %5 : vector<1x256xi1> to vector<4x256xi1>
    %c15_i32 = arith.constant 15 : i32
    %7 = vector.broadcast %c15_i32 : i32 to vector<1x256xi32>
    %8 = arith.cmpi eq, %1, %7 : vector<1x256xi32>
    %9 = vector.shape_cast %8 : vector<1x256xi1> to vector<1x256xi1>
    %10 = vector.broadcast %9 : vector<1x256xi1> to vector<4x256xi1>
    %c0_i32_1 = arith.constant 0 : i32
    %11 = vector.broadcast %c0_i32_1 : i32 to vector<1x256xi32>
    %12 = arith.cmpi eq, %2, %11 : vector<1x256xi32>
    %13 = vector.shape_cast %12 : vector<1x256xi1> to vector<1x256xi1>
    %14 = vector.broadcast %13 : vector<1x256xi1> to vector<4x256xi1>
    %c15_i32_2 = arith.constant 15 : i32
    %15 = vector.broadcast %c15_i32_2 : i32 to vector<1x256xi32>
    %16 = arith.cmpi eq, %2, %15 : vector<1x256xi32>
    %17 = vector.shape_cast %16 : vector<1x256xi1> to vector<1x256xi1>
    %18 = vector.broadcast %17 : vector<1x256xi1> to vector<4x256xi1>
    %c0_3 = arith.constant 0 : index
    %c0_4 = arith.constant 0 : index
    %19 = vector.load %arg3[%c0_3, %c0_4] : memref<4x36xf32, #tpu.memory_space<vmem>>, vector<4x36xf32>
    %c0_5 = arith.constant 0 : index
    %c0_6 = arith.constant 0 : index
    %20 = vector.load %arg5[%c0_5, %c0_6] : memref<4x36xf32, #tpu.memory_space<vmem>>, vector<4x36xf32>
    %c0_7 = arith.constant 0 : index
    %c0_8 = arith.constant 0 : index
    %21 = vector.load %arg4[%c0_7, %c0_8] : memref<4x1xf32, #tpu.memory_space<vmem>>, vector<4x1xf32>
    %22 = vector.shape_cast %21 : vector<4x1xf32> to vector<4x1xf32>
    %23 = vector.broadcast %22 : vector<4x1xf32> to vector<4x256xf32>
    %c0_9 = arith.constant 0 : index
    %c0_10 = arith.constant 0 : index
    %24 = vector.load %arg6[%c0_9, %c0_10] : memref<4x1xf32, #tpu.memory_space<vmem>>, vector<4x1xf32>
    %25 = vector.shape_cast %24 : vector<4x1xf32> to vector<4x1xf32>
    %26 = vector.broadcast %25 : vector<4x1xf32> to vector<4x256xf32>
    %c0_11 = arith.constant 0 : index
    %c0_12 = arith.constant 0 : index
    %c0_13 = arith.constant 0 : index
    %27 = vector.load %arg1[%c0_11, %c0_12, %c0_13] : memref<1x4x256xf32, #tpu.memory_space<vmem>>, vector<1x4x256xf32>
    %28 = vector.shape_cast %27 : vector<1x4x256xf32> to vector<4x256xf32>
    %c16_i32 = arith.constant 16 : i32
    %29 = tpu.dynamic_rotate %28 by %c16_i32 dim 1 : vector<4x256xf32>, i32 -> vector<4x256xf32>
    %c240_i32 = arith.constant 240 : i32
    %30 = tpu.dynamic_rotate %28 by %c240_i32 dim 1 : vector<4x256xf32>, i32 -> vector<4x256xf32>
    %31 = arith.select %6, %30, %29 : vector<4x256xi1>, vector<4x256xf32>
    %32 = arith.select %10, %29, %30 : vector<4x256xi1>, vector<4x256xf32>
    %c1_i32 = arith.constant 1 : i32
    %33 = tpu.dynamic_rotate %31 by %c1_i32 dim 1 : vector<4x256xf32>, i32 -> vector<4x256xf32>
    %c255_i32 = arith.constant 255 : i32
    %34 = tpu.dynamic_rotate %31 by %c255_i32 dim 1 : vector<4x256xf32>, i32 -> vector<4x256xf32>
    %35 = arith.select %14, %34, %33 : vector<4x256xi1>, vector<4x256xf32>
    %36 = arith.select %18, %33, %34 : vector<4x256xi1>, vector<4x256xf32>
    %c1_i32_14 = arith.constant 1 : i32
    %37 = tpu.dynamic_rotate %28 by %c1_i32_14 dim 1 : vector<4x256xf32>, i32 -> vector<4x256xf32>
    %c255_i32_15 = arith.constant 255 : i32
    %38 = tpu.dynamic_rotate %28 by %c255_i32_15 dim 1 : vector<4x256xf32>, i32 -> vector<4x256xf32>
    %39 = arith.select %14, %38, %37 : vector<4x256xi1>, vector<4x256xf32>
    %40 = arith.select %18, %37, %38 : vector<4x256xi1>, vector<4x256xf32>
    %c1_i32_16 = arith.constant 1 : i32
    %41 = tpu.dynamic_rotate %32 by %c1_i32_16 dim 1 : vector<4x256xf32>, i32 -> vector<4x256xf32>
    %c255_i32_17 = arith.constant 255 : i32
    %42 = tpu.dynamic_rotate %32 by %c255_i32_17 dim 1 : vector<4x256xf32>, i32 -> vector<4x256xf32>
    %43 = arith.select %14, %42, %41 : vector<4x256xi1>, vector<4x256xf32>
    %44 = arith.select %18, %41, %42 : vector<4x256xi1>, vector<4x256xf32>
    %45 = tpu.concatenate %35, %31, %36, %39, %28, %40, %43, %32, %44 in 0 : vector<4x256xf32>, vector<4x256xf32>, vector<4x256xf32>, vector<4x256xf32>, vector<4x256xf32>, vector<4x256xf32>, vector<4x256xf32>, vector<4x256xf32>, vector<4x256xf32> -> vector<36x256xf32>
    %cst = arith.constant dense<0.000000e+00> : vector<4x256xf32>
    %46 = tpu.matmul %19, %45, %cst {dimension_numbers = #tpu.dot_dimension_numbers<[1], [0], [0], [1], [0, 0, 1, 1], [], []>} : vector<4x36xf32>, vector<36x256xf32>, vector<4x256xf32> -> vector<4x256xf32>
    %47 = arith.addf %46, %23 : vector<4x256xf32>
    %cst_18 = arith.constant dense<0.000000e+00> : vector<4xf32>
    %48 = vector.multi_reduction <add>, %47, %cst_18 [1] : vector<4x256xf32> to vector<4xf32>
    %49 = vector.shape_cast %48 : vector<4xf32> to vector<4x1xf32>
    %cst_19 = arith.constant 3.906250e-03 : f32
    %50 = vector.broadcast %cst_19 : f32 to vector<4x1xf32>
    %51 = arith.mulf %49, %50 : vector<4x1xf32>
    %52 = vector.broadcast %51 : vector<4x1xf32> to vector<4x256xf32>
    %53 = arith.subf %47, %52 : vector<4x256xf32>
    %54 = arith.mulf %53, %53 : vector<4x256xf32>
    %cst_20 = arith.constant dense<0.000000e+00> : vector<4xf32>
    %55 = vector.multi_reduction <add>, %54, %cst_20 [1] : vector<4x256xf32> to vector<4xf32>
    %56 = vector.shape_cast %55 : vector<4xf32> to vector<4x1xf32>
    %cst_21 = arith.constant 3.906250e-03 : f32
    %57 = vector.broadcast %cst_21 : f32 to vector<4x1xf32>
    %58 = arith.mulf %56, %57 : vector<4x1xf32>
    %cst_22 = arith.constant 9.99999974E-6 : f32
    %59 = vector.broadcast %cst_22 : f32 to vector<4x1xf32>
    %60 = arith.addf %58, %59 : vector<4x1xf32>
    %61 = math.rsqrt %60 : vector<4x1xf32>
    %62 = vector.broadcast %61 : vector<4x1xf32> to vector<4x256xf32>
    %63 = arith.mulf %53, %62 : vector<4x256xf32>
    %cst_23 = arith.constant 0.000000e+00 : f32
    %64 = vector.broadcast %cst_23 : f32 to vector<4x256xf32>
    %65 = arith.maximumf %63, %64 : vector<4x256xf32>
    %c16_i32_24 = arith.constant 16 : i32
    %66 = tpu.dynamic_rotate %65 by %c16_i32_24 dim 1 : vector<4x256xf32>, i32 -> vector<4x256xf32>
    %c240_i32_25 = arith.constant 240 : i32
    %67 = tpu.dynamic_rotate %65 by %c240_i32_25 dim 1 : vector<4x256xf32>, i32 -> vector<4x256xf32>
    %68 = arith.select %6, %67, %66 : vector<4x256xi1>, vector<4x256xf32>
    %69 = arith.select %10, %66, %67 : vector<4x256xi1>, vector<4x256xf32>
    %c1_i32_26 = arith.constant 1 : i32
    %70 = tpu.dynamic_rotate %68 by %c1_i32_26 dim 1 : vector<4x256xf32>, i32 -> vector<4x256xf32>
    %c255_i32_27 = arith.constant 255 : i32
    %71 = tpu.dynamic_rotate %68 by %c255_i32_27 dim 1 : vector<4x256xf32>, i32 -> vector<4x256xf32>
    %72 = arith.select %14, %71, %70 : vector<4x256xi1>, vector<4x256xf32>
    %73 = arith.select %18, %70, %71 : vector<4x256xi1>, vector<4x256xf32>
    %c1_i32_28 = arith.constant 1 : i32
    %74 = tpu.dynamic_rotate %65 by %c1_i32_28 dim 1 : vector<4x256xf32>, i32 -> vector<4x256xf32>
    %c255_i32_29 = arith.constant 255 : i32
    %75 = tpu.dynamic_rotate %65 by %c255_i32_29 dim 1 : vector<4x256xf32>, i32 -> vector<4x256xf32>
    %76 = arith.select %14, %75, %74 : vector<4x256xi1>, vector<4x256xf32>
    %77 = arith.select %18, %74, %75 : vector<4x256xi1>, vector<4x256xf32>
    %c1_i32_30 = arith.constant 1 : i32
    %78 = tpu.dynamic_rotate %69 by %c1_i32_30 dim 1 : vector<4x256xf32>, i32 -> vector<4x256xf32>
    %c255_i32_31 = arith.constant 255 : i32
    %79 = tpu.dynamic_rotate %69 by %c255_i32_31 dim 1 : vector<4x256xf32>, i32 -> vector<4x256xf32>
    %80 = arith.select %14, %79, %78 : vector<4x256xi1>, vector<4x256xf32>
    %81 = arith.select %18, %78, %79 : vector<4x256xi1>, vector<4x256xf32>
    %82 = tpu.concatenate %72, %68, %73, %76, %65, %77, %80, %69, %81 in 0 : vector<4x256xf32>, vector<4x256xf32>, vector<4x256xf32>, vector<4x256xf32>, vector<4x256xf32>, vector<4x256xf32>, vector<4x256xf32>, vector<4x256xf32>, vector<4x256xf32> -> vector<36x256xf32>
    %cst_32 = arith.constant dense<0.000000e+00> : vector<4x256xf32>
    %83 = tpu.matmul %20, %82, %cst_32 {dimension_numbers = #tpu.dot_dimension_numbers<[1], [0], [0], [1], [0, 0, 1, 1], [], []>} : vector<4x36xf32>, vector<36x256xf32>, vector<4x256xf32> -> vector<4x256xf32>
    %84 = arith.addf %83, %26 : vector<4x256xf32>
    %cst_33 = arith.constant dense<0.000000e+00> : vector<4xf32>
    %85 = vector.multi_reduction <add>, %84, %cst_33 [1] : vector<4x256xf32> to vector<4xf32>
    %86 = vector.shape_cast %85 : vector<4xf32> to vector<4x1xf32>
    %cst_34 = arith.constant 3.906250e-03 : f32
    %87 = vector.broadcast %cst_34 : f32 to vector<4x1xf32>
    %88 = arith.mulf %86, %87 : vector<4x1xf32>
    %89 = vector.broadcast %88 : vector<4x1xf32> to vector<4x256xf32>
    %90 = arith.subf %84, %89 : vector<4x256xf32>
    %91 = arith.mulf %90, %90 : vector<4x256xf32>
    %cst_35 = arith.constant dense<0.000000e+00> : vector<4xf32>
    %92 = vector.multi_reduction <add>, %91, %cst_35 [1] : vector<4x256xf32> to vector<4xf32>
    %93 = vector.shape_cast %92 : vector<4xf32> to vector<4x1xf32>
    %cst_36 = arith.constant 3.906250e-03 : f32
    %94 = vector.broadcast %cst_36 : f32 to vector<4x1xf32>
    %95 = arith.mulf %93, %94 : vector<4x1xf32>
    %cst_37 = arith.constant 9.99999974E-6 : f32
    %96 = vector.broadcast %cst_37 : f32 to vector<4x1xf32>
    %97 = arith.addf %95, %96 : vector<4x1xf32>
    %98 = math.rsqrt %97 : vector<4x1xf32>
    %99 = vector.broadcast %98 : vector<4x1xf32> to vector<4x256xf32>
    %100 = arith.mulf %90, %99 : vector<4x256xf32>
    %101 = arith.addf %28, %100 : vector<4x256xf32>
    %c0_38 = arith.constant 0 : index
    %c0_39 = arith.constant 0 : index
    %c0_40 = arith.constant 0 : index
    %102 = vector.load %arg7[%c0_38, %c0_39, %c0_40] : memref<1x4x256xf32, #tpu.memory_space<vmem>>, vector<1x4x256xf32>
    %103 = vector.shape_cast %102 : vector<1x4x256xf32> to vector<4x256xf32>
    %104 = vector.shape_cast %101 : vector<4x256xf32> to vector<1x4x256xf32>
    tpu.vector_store %arg7[%c0_38, %c0_39, %c0_40], %104 {strides = array<i32>} : memref<1x4x256xf32, #tpu.memory_space<vmem>>, vector<1x4x256xf32>,
    return
  }
  func.func @transform_0(%arg0: i32) -> (i32, i32, i32) {
    %c0_i32 = arith.constant 0 : i32
    %c0_i32_0 = arith.constant 0 : i32
    %c0_i32_1 = arith.constant 0 : i32
    return %arg0, %c0_i32, %c0_i32_0 : i32, i32, i32
  }
  func.func @transform_1(%arg0: i32) -> (i32, i32) {
    %c0_i32 = arith.constant 0 : i32
    %c0_i32_0 = arith.constant 0 : i32
    %c0_i32_1 = arith.constant 0 : i32
    return %c0_i32, %c0_i32_0 : i32, i32
  }
  func.func @transform_2(%arg0: i32) -> (i32, i32) {
    %c0_i32 = arith.constant 0 : i32
    %c0_i32_0 = arith.constant 0 : i32
    %c0_i32_1 = arith.constant 0 : i32
    return %c0_i32, %c0_i32_0 : i32, i32
  }
  func.func @transform_3(%arg0: i32) -> (i32, i32) {
    %c0_i32 = arith.constant 0 : i32
    %c0_i32_0 = arith.constant 0 : i32
    %c0_i32_1 = arith.constant 0 : i32
    return %c0_i32, %c0_i32_0 : i32, i32
  }
  func.func @transform_4(%arg0: i32) -> (i32, i32) {
    %c0_i32 = arith.constant 0 : i32
    %c0_i32_0 = arith.constant 0 : i32
    %c0_i32_1 = arith.constant 0 : i32
    return %c0_i32, %c0_i32_0 : i32, i32
  }
  func.func @transform_5(%arg0: i32) -> (i32, i32) {
    %c0_i32 = arith.constant 0 : i32
    %c0_i32_0 = arith.constant 0 : i32
    %c0_i32_1 = arith.constant 0 : i32
    return %c0_i32, %c0_i32_0 : i32, i32
  }
  func.func @transform_6(%arg0: i32) -> (i32, i32, i32) {
    %c0_i32 = arith.constant 0 : i32
    %c0_i32_0 = arith.constant 0 : i32
    %c0_i32_1 = arith.constant 0 : i32
    return %arg0, %c0_i32, %c0_i32_0 : i32, i32, i32
  }
}

module attributes {stable_mosaic.version = 11 : i64} {
  func.func @_resnet_block_kernel(%arg0: i32, %arg1: memref<1x4x256xf32, #tpu.memory_space<vmem>>, %arg2: memref<2x256xi32, #tpu.memory_space<vmem>>, %arg3: memref<4x36xf32, #tpu.memory_space<vmem>>, %arg4: memref<4x1xf32, #tpu.memory_space<vmem>>, %arg5: memref<4x36xf32, #tpu.memory_space<vmem>>, %arg6: memref<4x1xf32, #tpu.memory_space<vmem>>, %arg7: memref<1x4x256xf32, #tpu.memory_space<vmem>>) attributes {dimension_semantics = [#tpu.dimension_semantics<parallel>], iteration_bounds = array<i64: 2>, scalar_prefetch = 0 : i64, scratch_operands = 0 : i64, tpu.core_type = #tpu.core_type<tc>, window_params = [{transform_indices = @transform_0, window_bounds = array<i64: 1, 4, 256>}, {pipeline_mode = #tpu.pipeline_mode<synchronous>, transform_indices = @transform_1, window_bounds = array<i64: 2, 256>}, {pipeline_mode = #tpu.pipeline_mode<synchronous>, transform_indices = @transform_2, window_bounds = array<i64: 4, 36>}, {pipeline_mode = #tpu.pipeline_mode<synchronous>, transform_indices = @transform_3, window_bounds = array<i64: 4, 1>}, {pipeline_mode = #tpu.pipeline_mode<synchronous>, transform_indices = @transform_4, window_bounds = array<i64: 4, 36>}, {pipeline_mode = #tpu.pipeline_mode<synchronous>, transform_indices = @transform_5, window_bounds = array<i64: 4, 1>}, {transform_indices = @transform_6, window_bounds = array<i64: 1, 4, 256>}]} {
    %c0 = arith.constant 0 : index
    %c0_0 = arith.constant 0 : index
    %0 = vector.load %arg2[%c0, %c0_0] : memref<2x256xi32, #tpu.memory_space<vmem>>, vector<2x256xi32>
    %1 = vector.extract_strided_slice %0 {offsets = [0, 0], sizes = [1, 256], strides = [1, 1]} : vector<2x256xi32> to vector<1x256xi32>
    %2 = vector.extract_strided_slice %0 {offsets = [1, 0], sizes = [1, 256], strides = [1, 1]} : vector<2x256xi32> to vector<1x256xi32>
    %c0_i32 = arith.constant 0 : i32
    %3 = vector.broadcast %c0_i32 : i32 to vector<1x256xi32>
    %4 = arith.cmpi eq, %1, %3 : vector<1x256xi32>
    %5 = vector.shape_cast %4 : vector<1x256xi1> to vector<1x256xi1>
    %6 = vector.broadcast %5 : vector<1x256xi1> to vector<4x256xi1>
    %c15_i32 = arith.constant 15 : i32
    %7 = vector.broadcast %c15_i32 : i32 to vector<1x256xi32>
    %8 = arith.cmpi eq, %1, %7 : vector<1x256xi32>
    %9 = vector.shape_cast %8 : vector<1x256xi1> to vector<1x256xi1>
    %10 = vector.broadcast %9 : vector<1x256xi1> to vector<4x256xi1>
    %c0_i32_1 = arith.constant 0 : i32
    %11 = vector.broadcast %c0_i32_1 : i32 to vector<1x256xi32>
    %12 = arith.cmpi eq, %2, %11 : vector<1x256xi32>
    %13 = vector.shape_cast %12 : vector<1x256xi1> to vector<1x256xi1>
    %14 = vector.broadcast %13 : vector<1x256xi1> to vector<4x256xi1>
    %c15_i32_2 = arith.constant 15 : i32
    %15 = vector.broadcast %c15_i32_2 : i32 to vector<1x256xi32>
    %16 = arith.cmpi eq, %2, %15 : vector<1x256xi32>
    %17 = vector.shape_cast %16 : vector<1x256xi1> to vector<1x256xi1>
    %18 = vector.broadcast %17 : vector<1x256xi1> to vector<4x256xi1>
    %c0_3 = arith.constant 0 : index
    %c0_4 = arith.constant 0 : index
    %19 = vector.load %arg3[%c0_3, %c0_4] : memref<4x36xf32, #tpu.memory_space<vmem>>, vector<4x36xf32>
    %c0_5 = arith.constant 0 : index
    %c0_6 = arith.constant 0 : index
    %20 = vector.load %arg5[%c0_5, %c0_6] : memref<4x36xf32, #tpu.memory_space<vmem>>, vector<4x36xf32>
    %c0_7 = arith.constant 0 : index
    %c0_8 = arith.constant 0 : index
    %21 = vector.load %arg4[%c0_7, %c0_8] : memref<4x1xf32, #tpu.memory_space<vmem>>, vector<4x1xf32>
    %22 = vector.shape_cast %21 : vector<4x1xf32> to vector<4x1xf32>
    %23 = vector.broadcast %22 : vector<4x1xf32> to vector<4x256xf32>
    %c0_9 = arith.constant 0 : index
    %c0_10 = arith.constant 0 : index
    %24 = vector.load %arg6[%c0_9, %c0_10] : memref<4x1xf32, #tpu.memory_space<vmem>>, vector<4x1xf32>
    %25 = vector.shape_cast %24 : vector<4x1xf32> to vector<4x1xf32>
    %26 = vector.broadcast %25 : vector<4x1xf32> to vector<4x256xf32>
    %c0_11 = arith.constant 0 : index
    %c0_12 = arith.constant 0 : index
    %c0_13 = arith.constant 0 : index
    %27 = vector.load %arg1[%c0_11, %c0_12, %c0_13] : memref<1x4x256xf32, #tpu.memory_space<vmem>>, vector<1x4x256xf32>
    %28 = vector.shape_cast %27 : vector<1x4x256xf32> to vector<4x256xf32>
    %c16_i32 = arith.constant 16 : i32
    %29 = tpu.dynamic_rotate %28 by %c16_i32 dim 1 : vector<4x256xf32>, i32 -> vector<4x256xf32>
    %c240_i32 = arith.constant 240 : i32
    %30 = tpu.dynamic_rotate %28 by %c240_i32 dim 1 : vector<4x256xf32>, i32 -> vector<4x256xf32>
    %31 = arith.select %6, %30, %29 : vector<4x256xi1>, vector<4x256xf32>
    %32 = arith.select %10, %29, %30 : vector<4x256xi1>, vector<4x256xf32>
    %c1_i32 = arith.constant 1 : i32
    %33 = tpu.dynamic_rotate %31 by %c1_i32 dim 1 : vector<4x256xf32>, i32 -> vector<4x256xf32>
    %c255_i32 = arith.constant 255 : i32
    %34 = tpu.dynamic_rotate %31 by %c255_i32 dim 1 : vector<4x256xf32>, i32 -> vector<4x256xf32>
    %35 = arith.select %14, %34, %33 : vector<4x256xi1>, vector<4x256xf32>
    %36 = arith.select %18, %33, %34 : vector<4x256xi1>, vector<4x256xf32>
    %c1_i32_14 = arith.constant 1 : i32
    %37 = tpu.dynamic_rotate %28 by %c1_i32_14 dim 1 : vector<4x256xf32>, i32 -> vector<4x256xf32>
    %c255_i32_15 = arith.constant 255 : i32
    %38 = tpu.dynamic_rotate %28 by %c255_i32_15 dim 1 : vector<4x256xf32>, i32 -> vector<4x256xf32>
    %39 = arith.select %14, %38, %37 : vector<4x256xi1>, vector<4x256xf32>
    %40 = arith.select %18, %37, %38 : vector<4x256xi1>, vector<4x256xf32>
    %c1_i32_16 = arith.constant 1 : i32
    %41 = tpu.dynamic_rotate %32 by %c1_i32_16 dim 1 : vector<4x256xf32>, i32 -> vector<4x256xf32>
    %c255_i32_17 = arith.constant 255 : i32
    %42 = tpu.dynamic_rotate %32 by %c255_i32_17 dim 1 : vector<4x256xf32>, i32 -> vector<4x256xf32>
    %43 = arith.select %14, %42, %41 : vector<4x256xi1>, vector<4x256xf32>
    %44 = arith.select %18, %41, %42 : vector<4x256xi1>, vector<4x256xf32>
    %45 = tpu.concatenate %35, %31, %36, %39, %28, %40, %43, %32, %44 in 0 : vector<4x256xf32>, vector<4x256xf32>, vector<4x256xf32>, vector<4x256xf32>, vector<4x256xf32>, vector<4x256xf32>, vector<4x256xf32>, vector<4x256xf32>, vector<4x256xf32> -> vector<36x256xf32>
    %cst = arith.constant dense<0.000000e+00> : vector<4x256xf32>
    %46 = tpu.matmul %19, %45, %cst {dimension_numbers = #tpu.dot_dimension_numbers<[1], [0], [0], [1], [0, 0, 1, 1], [], []>} : vector<4x36xf32>, vector<36x256xf32>, vector<4x256xf32> -> vector<4x256xf32>
    %47 = arith.addf %46, %23 : vector<4x256xf32>
    %cst_18 = arith.constant dense<0.000000e+00> : vector<4xf32>
    %48 = vector.multi_reduction <add>, %47, %cst_18 [1] : vector<4x256xf32> to vector<4xf32>
    %49 = vector.shape_cast %48 : vector<4xf32> to vector<4x1xf32>
    %cst_19 = arith.constant 3.906250e-03 : f32
    %50 = vector.broadcast %cst_19 : f32 to vector<4x1xf32>
    %51 = arith.mulf %49, %50 : vector<4x1xf32>
    %52 = vector.broadcast %51 : vector<4x1xf32> to vector<4x256xf32>
    %53 = arith.subf %47, %52 : vector<4x256xf32>
    %54 = arith.mulf %53, %53 : vector<4x256xf32>
    %cst_20 = arith.constant dense<0.000000e+00> : vector<4xf32>
    %55 = vector.multi_reduction <add>, %54, %cst_20 [1] : vector<4x256xf32> to vector<4xf32>
    %56 = vector.shape_cast %55 : vector<4xf32> to vector<4x1xf32>
    %cst_21 = arith.constant 3.906250e-03 : f32
    %57 = vector.broadcast %cst_21 : f32 to vector<4x1xf32>
    %58 = arith.mulf %56, %57 : vector<4x1xf32>
    %cst_22 = arith.constant 9.99999974E-6 : f32
    %59 = vector.broadcast %cst_22 : f32 to vector<4x1xf32>
    %60 = arith.addf %58, %59 : vector<4x1xf32>
    %61 = math.rsqrt %60 : vector<4x1xf32>
    %62 = vector.broadcast %61 : vector<4x1xf32> to vector<4x256xf32>
    %63 = arith.mulf %53, %62 : vector<4x256xf32>
    %cst_23 = arith.constant 0.000000e+00 : f32
    %64 = vector.broadcast %cst_23 : f32 to vector<4x256xf32>
    %65 = arith.maximumf %63, %64 : vector<4x256xf32>
    %c16_i32_24 = arith.constant 16 : i32
    %66 = tpu.dynamic_rotate %65 by %c16_i32_24 dim 1 : vector<4x256xf32>, i32 -> vector<4x256xf32>
    %c240_i32_25 = arith.constant 240 : i32
    %67 = tpu.dynamic_rotate %65 by %c240_i32_25 dim 1 : vector<4x256xf32>, i32 -> vector<4x256xf32>
    %68 = arith.select %6, %67, %66 : vector<4x256xi1>, vector<4x256xf32>
    %69 = arith.select %10, %66, %67 : vector<4x256xi1>, vector<4x256xf32>
    %c1_i32_26 = arith.constant 1 : i32
    %70 = tpu.dynamic_rotate %68 by %c1_i32_26 dim 1 : vector<4x256xf32>, i32 -> vector<4x256xf32>
    %c255_i32_27 = arith.constant 255 : i32
    %71 = tpu.dynamic_rotate %68 by %c255_i32_27 dim 1 : vector<4x256xf32>, i32 -> vector<4x256xf32>
    %72 = arith.select %14, %71, %70 : vector<4x256xi1>, vector<4x256xf32>
    %73 = arith.select %18, %70, %71 : vector<4x256xi1>, vector<4x256xf32>
    %c1_i32_28 = arith.constant 1 : i32
    %74 = tpu.dynamic_rotate %65 by %c1_i32_28 dim 1 : vector<4x256xf32>, i32 -> vector<4x256xf32>
    %c255_i32_29 = arith.constant 255 : i32
    %75 = tpu.dynamic_rotate %65 by %c255_i32_29 dim 1 : vector<4x256xf32>, i32 -> vector<4x256xf32>
    %76 = arith.select %14, %75, %74 : vector<4x256xi1>, vector<4x256xf32>
    %77 = arith.select %18, %74, %75 : vector<4x256xi1>, vector<4x256xf32>
    %c1_i32_30 = arith.constant 1 : i32
    %78 = tpu.dynamic_rotate %69 by %c1_i32_30 dim 1 : vector<4x256xf32>, i32 -> vector<4x256xf32>
    %c255_i32_31 = arith.constant 255 : i32
    %79 = tpu.dynamic_rotate %69 by %c255_i32_31 dim 1 : vector<4x256xf32>, i32 -> vector<4x256xf32>
    %80 = arith.select %14, %79, %78 : vector<4x256xi1>, vector<4x256xf32>
    %81 = arith.select %18, %78, %79 : vector<4x256xi1>, vector<4x256xf32>
    %82 = tpu.concatenate %72, %68, %73, %76, %65, %77, %80, %69, %81 in 0 : vector<4x256xf32>, vector<4x256xf32>, vector<4x256xf32>, vector<4x256xf32>, vector<4x256xf32>, vector<4x256xf32>, vector<4x256xf32>, vector<4x256xf32>, vector<4x256xf32> -> vector<36x256xf32>
    %cst_32 = arith.constant dense<0.000000e+00> : vector<4x256xf32>
    %83 = tpu.matmul %20, %82, %cst_32 {dimension_numbers = #tpu.dot_dimension_numbers<[1], [0], [0], [1], [0, 0, 1, 1], [], []>} : vector<4x36xf32>, vector<36x256xf32>, vector<4x256xf32> -> vector<4x256xf32>
    %84 = arith.addf %83, %26 : vector<4x256xf32>
    %cst_33 = arith.constant dense<0.000000e+00> : vector<4xf32>
    %85 = vector.multi_reduction <add>, %84, %cst_33 [1] : vector<4x256xf32> to vector<4xf32>
    %86 = vector.shape_cast %85 : vector<4xf32> to vector<4x1xf32>
    %cst_34 = arith.constant 3.906250e-03 : f32
    %87 = vector.broadcast %cst_34 : f32 to vector<4x1xf32>
    %88 = arith.mulf %86, %87 : vector<4x1xf32>
    %89 = vector.broadcast %88 : vector<4x1xf32> to vector<4x256xf32>
    %90 = arith.subf %84, %89 : vector<4x256xf32>
    %91 = arith.mulf %90, %90 : vector<4x256xf32>
    %cst_35 = arith.constant dense<0.000000e+00> : vector<4xf32>
    %92 = vector.multi_reduction <add>, %91, %cst_35 [1] : vector<4x256xf32> to vector<4xf32>
    %93 = vector.shape_cast %92 : vector<4xf32> to vector<4x1xf32>
    %cst_36 = arith.constant 3.906250e-03 : f32
    %94 = vector.broadcast %cst_36 : f32 to vector<4x1xf32>
    %95 = arith.mulf %93, %94 : vector<4x1xf32>
    %cst_37 = arith.constant 9.99999974E-6 : f32
    %96 = vector.broadcast %cst_37 : f32 to vector<4x1xf32>
    %97 = arith.addf %95, %96 : vector<4x1xf32>
    %98 = math.rsqrt %97 : vector<4x1xf32>
    %99 = vector.broadcast %98 : vector<4x1xf32> to vector<4x256xf32>
    %100 = arith.mulf %90, %99 : vector<4x256xf32>
    %101 = arith.addf %28, %100 : vector<4x256xf32>
    %c0_38 = arith.constant 0 : index
    %c0_39 = arith.constant 0 : index
    %c0_40 = arith.constant 0 : index
    %102 = vector.load %arg7[%c0_38, %c0_39, %c0_40] : memref<1x4x256xf32, #tpu.memory_space<vmem>>, vector<1x4x256xf32>
    %103 = vector.shape_cast %102 : vector<1x4x256xf32> to vector<4x256xf32>
    %104 = vector.shape_cast %101 : vector<4x256xf32> to vector<1x4x256xf32>
    tpu.vector_store %arg7[%c0_38, %c0_39, %c0_40], %104 {strides = array<i32>} : memref<1x4x256xf32, #tpu.memory_space<vmem>>, vector<1x4x256xf32>,
    return
  }
  func.func @transform_0(%arg0: i32) -> (i32, i32, i32) {
    %c0_i32 = arith.constant 0 : i32
    %c0_i32_0 = arith.constant 0 : i32
    %c0_i32_1 = arith.constant 0 : i32
    return %arg0, %c0_i32, %c0_i32_0 : i32, i32, i32
  }
  func.func @transform_1(%arg0: i32) -> (i32, i32) {
    %c0_i32 = arith.constant 0 : i32
    %c0_i32_0 = arith.constant 0 : i32
    %c0_i32_1 = arith.constant 0 : i32
    return %c0_i32, %c0_i32_0 : i32, i32
  }
  func.func @transform_2(%arg0: i32) -> (i32, i32) {
    %c0_i32 = arith.constant 0 : i32
    %c0_i32_0 = arith.constant 0 : i32
    %c0_i32_1 = arith.constant 0 : i32
    return %c0_i32, %c0_i32_0 : i32, i32
  }
  func.func @transform_3(%arg0: i32) -> (i32, i32) {
    %c0_i32 = arith.constant 0 : i32
    %c0_i32_0 = arith.constant 0 : i32
    %c0_i32_1 = arith.constant 0 : i32
    return %c0_i32, %c0_i32_0 : i32, i32
  }
  func.func @transform_4(%arg0: i32) -> (i32, i32) {
    %c0_i32 = arith.constant 0 : i32
    %c0_i32_0 = arith.constant 0 : i32
    %c0_i32_1 = arith.constant 0 : i32
    return %c0_i32, %c0_i32_0 : i32, i32
  }
  func.func @transform_5(%arg0: i32) -> (i32, i32) {
    %c0_i32 = arith.constant 0 : i32
    %c0_i32_0 = arith.constant 0 : i32
    %c0_i32_1 = arith.constant 0 : i32
    return %c0_i32, %c0_i32_0 : i32, i32
  }
  func.func @transform_6(%arg0: i32) -> (i32, i32, i32) {
    %c0_i32 = arith.constant 0 : i32
    %c0_i32_0 = arith.constant 0 : i32
    %c0_i32_1 = arith.constant 0 : i32
    return %arg0, %c0_i32, %c0_i32_0 : i32, i32, i32
  }
}

</mosaic_0001>

<bundles_post_ra>
// kernel: tpu_custom_call.1
= control target key start
LH: loop header
LB: loop body
LE: loop exit
PB: predicated region body
PF: predicated region fallthrough
CT: control target
= control target key end

     0   :  { %11 = vsyncpa [#allocation3], 0  ;;  %s1608_s0 = inlined_call_operand.hbm [shape: f32[2,4,256], index: 0, kind: input, shape index: {}]   ;;  %s1609_s1 = inlined_call_operand.vmem [shape: s32[2,256], index: 1, kind: input, shape index: {}]   ;;  %s1610_s2 = inlined_call_operand.vmem [shape: f32[4,36], index: 2, kind: input, shape index: {}]   ;;  %s1611_s3 = inlined_call_operand.vmem [shape: f32[4,1], index: 3, kind: input, shape index: {}]   ;;  %s1612_s4 = inlined_call_operand.vmem [shape: f32[4,36], index: 4, kind: input, shape index: {}]   ;;  %s1613_s5 = inlined_call_operand.vmem [shape: f32[4,1], index: 5, kind: input, shape index: {}]   ;;  %s1614_s6 = inlined_call_operand.hbm [shape: f32[2,4,256], index: 6, kind: output, shape index: {}]  }
   0x1   :  { %13 = vsyncpa [#allocation3 + $0x1], 0 }
   0x2   :  { %14 = vsyncpa [#allocation4], 0 }
   0x3   :  { %16 = vsyncpa [#allocation4 + $0x1], 0  ;;  %s1133_s21 = smov 0   ;;  %s1135_s22 = smov 0  }
   0x4   :  { %s1137_s23 = smov 0   ;;  %s1139_s24 = smov 0  }
   0x5 LB: > { %s1154_s25 = sadd.s32 4294967295, %s1088_s24   ;;  %s856_s26 = sadd.s32 4294967294, %s1088_s24   ;;  %s1088_s24 = sphi %s1139_s24, %s1637_s24   ;;  %s1084_s23 = sphi %s1137_s23, %s1636_s23   ;;  %s1080_s22 = sphi %s1135_s22, %s1635_s22   ;;  %s1076_s21 = sphi %s1133_s21, %s1634_s21  }
   0x6   : > { %s1158_s27 = sadd.s32 1, %s1088_s24   ;;  %s29_s28 = sadd.s32 1, %s1084_s23 }
   0x7   : > { %s26_s29 = ssub.s32 %s1088_s24, %s1158_s27  ;;  %p36_p0 = scmp.ne.s32.totalorder %s1084_s23, %s1080_s22 }
   0x8   : > { %p27_p1 = scmp.eq.s32.totalorder %s26_s29, 0  ;;  %p37_p2 = scmp.eq.s32.totalorder %s1088_s24, 0 }
   0x9   : > { %p42_p3 = scmp.ne.s32.totalorder %s1080_s22, %s1076_s21  ;;  %p43_p4 = scmp.eq.s32.totalorder %s1154_s25, 0 }
   0xa   : > { %s1170_s30 = scalar_select %p27_p1, %s1084_s23, %s29_s28  }
   0xb   : > { %p1172_p5 = por %p37_p2, %p36_p0  ;;  %p1176_p6 = por %p43_p4, %p42_p3 }
   0xc   : > { %p171_p7 = scmp.eq.s32.totalorder %s1154_s25, 1  ;;  %p177_p8 = scmp.eq.s32.totalorder %s856_s26, 1 }
   0xd   : > { %p906_p10 = scmp.lt.s32.totalorder %s1088_s24, 2  ;;  %s212_s11 = sand.u32 1, %s1084_s23  }
   0xe   : > { %p1183_p11 = por %p171_p7, %p36_p0  ;;  %p1187_p12 = por %p177_p8, %p42_p3 }
   0xf   : > { %s876_s12 = sshll.u32 %s1088_s24, 7  ;;  %s859_s13 = sshll.u32 %s212_s11, 3 }
  0x10   : > { %s1618_s9 = scalar_select %p1183_p11, 1, 0 }
  0x11   : > { %s1619_s10 = scalar_select %p1187_p12, 1, 0 }
  0x12   : > { %s1196_s16 = scalar_lea.hbm %s1608_s0, %s876_s12  ;;  %s216_s17 = scalar_lea.vmem [#allocation2], %s859_s13 }
  0x13   : > { %s224_s18 = sshll.u32 %s216_s17, 4  ;;  %p1200_p13 = pnand %p906_p10, %p1172_p5  ;;  %s1204_s18 = int_to_ptr.vmem [resolvable:$true] %s224_s18 }
  0x14   : > { %s213_s20 = scalar_lea.sflag [#allocation3], %s212_s11  ;;  %s992_s26 = scalar_lea.hbm %s1196_s16, 128 }
  0x15   : > { %p993_p2 = scmp.ne.s32.totalorder %s1196_s16, %s992_s26  ;;  %p994_p3 = pneg %p1200_p13 }
  0x16   : > { %s997_s7 = scalar_lea.hbm %s1608_s0, 256  ;;  %p998_p5 = scmp.lt.u32.totalorder %s1196_s16, %s1608_s0 }
  0x17   : > { %p995_p4 = pnand %p994_p3, %p993_p2  ;;  %p999_p8 = scmp.lt.u32.totalorder %s997_s7, %s992_s26 }
  0x18   : > { %p1001_p9 = scmp.lt.u32.totalorder %s992_s26, %s1196_s16 }
  0x19   : > { %p996_p7 = pneg %p995_p4  ;;  %p1000_p10 = por %p999_p8, %p998_p5 }
  0x1b   : > { %p1002_p0 = por %p1001_p9, %p1000_p10 }
  0x1d   : > { %p1003_p1 = pnand %p1002_p0, %p996_p7 }
  0x1f   : > { %1006 = shalt.err (!%p1003_p1)
}
  0x20   : > { %s1007_s11 = scalar_lea.vmem %s1204_s18, 128  ;;  %s1090_s14 = smov [#allocation2]  }
  0x21   : > { %p1008_p2 = scmp.ne.s32.totalorder %s1204_s18, %s1007_s11  ;;  %s1012_s15 = sshll.u32 %s1090_s14, 4  ;;  %s1013_s15 = int_to_ptr.vmem [resolvable:$false] %s1012_s15 }
  0x22   : > { %s1014_s17 = scalar_lea.vmem %s1013_s15, 256  ;;  %p1015_p11 = scmp.lt.s32.totalorder %s1204_s18, %s1013_s15 }
  0x23   : > { %p1010_p4 = pnand %p1008_p2, %p994_p3  ;;  %p1016_p5 = scmp.lt.s32.totalorder %s1014_s17, %s1007_s11 }
  0x25   : > { %p1011_p12 = pneg %p1010_p4  ;;  %p1017_p8 = por %p1016_p5, %p1015_p11 }
  0x27   : > { %p1018_p9 = pnand %p1017_p8, %p1011_p12 }
  0x29   : > { %1021 = shalt.err (!%p1018_p9)
}
  0x2a   : > { %901 = dma.hbm_to_vmem [thread:$0]  (!%p1200_p13), %s1196_s16, 128, %s1204_s18, %s213_s20  }
  0x2b   : > { %p1621_p0 = scmp.lt.s32.totalorder %s1088_s24, 3  ;;  %p1622_p1 = scmp.ge.s32.totalorder %s1088_s24, 1 }
  0x2d   : > { %p230_p3 = pnand %p1622_p1, %p1621_p0 }
  0x2e   : > { %s1238_s26 = sand.u32 (!%p230_p3), 1, %s1080_s22  }
  0x2f   : > { %233 = sbr.rel (%p230_p3) target bundleno = 1651 (0x673), region = 44  ;;  %s863_s28 = sshll.u32 (!%p230_p3), %s1238_s26, 3 }
  0x30   : > { %s236_s29 = scalar_lea.sflag (!%p230_p3), [#allocation3], %s1238_s26  ;;  %s239_s19 = scalar_lea.vmem (!%p230_p3), [#allocation2], %s863_s28 }
  0x36   : > { %1067 = dma.done.wait (%p1176_p6), %s236_s29, 128  }
  0x37   : > { %1069 = vsyncadd (%p1176_p6), %s236_s29, 4294967168  ;;  %v271_v0 = vlaneseq  ;;  %v1091_v1 = vmov 0   ;;  %v1250_v3 = vld [vmem:[%s239_s19] sm:$0xff]  ;;  %s1092_s20 = smov 112   ;;  %s1093_s8 = smov 16   ;;  %v1096_v41 = vmov 0.0  }
  0x38   : > { %966 = vset.pattern.permute.xlu0 %v1091_v1  ;;  %v268_v5 = vld [vmem:[%s1609_s1] sm:$0xf]  ;;  %372 = vrot.lane.b32.xlu1 %v1250_v3, %s1092_s20  ;;  %v1265_v7 = vcombine.high %v1250_v3, %v1250_v3  ;;  %s1094_s7 = smov 127   ;;  %s1095_s12 = smov 1   ;;  %vm457_vm14 = vcmask 1043456   ;;  %vm466_vm15 = vcmask 293888  }
  0x39   : > { %v1248_v2 = vshrl.u32 %v271_v0, 7  ;;  %363 = vrot.lane.b32.xlu0 %v1250_v3, %s1093_s8  ;;  %vm289_vm0 = vcmp.eq.s32.totalorder %v268_v5, 15  ;;  %vm269_vm1 = vcmp.eq.s32.totalorder %v268_v5, 0  ;;  %v1287_v19 = vand.u32 127, %v271_v0  ;;  %540 = vmatprep.mubr.f32.mxu0 %v1096_v41  ;;  %v347_v42 = vld [vmem:[%s1611_s3] sm:$0xf] }
  0x3a   : > { %v290_v8 = vsel %vm289_vm0, 1, %v1091_v1  ;;  %v951_v11 = vpack.i.bf16 %v1265_v7, %v1250_v3  ;;  %v270_v16 = vsel %vm269_vm1, 1, %v1091_v1  ;;  %738 = vmatprep.mubr.f32.mxu1 %v1096_v41  ;;  %v346_v53 = vld [vmem:[%s1612_s4] sm:$0xf]  ;;  %s877_s18 = sshll.u32 %s1154_s25, 7  ;;  %s772_s11 = scalar_lea.sflag [#allocation4], %s1238_s26 }
  0x3b   : > { %v1253_v4 = vsub.s32 1, %v1248_v2  ;;  %v315_v6 = vsub.s32 3, %v1248_v2  ;;  %v273_v14 = vsub.s32 0, %v1248_v2  ;;  %v277_v15 = vsub.s32 2, %v1248_v2  ;;  %s1564_s13 = scalar_lea.hbm %s1614_s6, %s877_s18  ;;  %p1631_p11 = scmp.ne.s32.totalorder %s1618_s9, 0 }
  0x3c   : > { %374 = vrot.lane.b32.xlu1 %v1265_v7, %s1092_s20  ;;  %vm376_vm2 = vcmp.lt.s32.totalorder %v1287_v19, 112  ;;  %vm369_vm3 = vcmp.lt.s32.totalorder %v1287_v19, 16  ;;  %vm387_vm8 = vcmp.lt.s32.totalorder %v1287_v19, 1  ;;  %vm394_vm9 = vcmp.lt.s32.totalorder %v1287_v19, 127  ;;  %s1097_s25 = smov [#allocation5]  }
  0x3d   : > { %v330_v9 = vrot.slane %v290_v8, %v1253_v4  ;;  %v1270_v10 = vrot.slane %v290_v8, %v315_v6  ;;  %365 = vrot.lane.b32.xlu0 %v1265_v7, %s1093_s8  ;;  %v274_v17 = vrot.slane %v270_v16, %v273_v14  ;;  %v278_v18 = vrot.slane %v270_v16, %v277_v15 }
  0x3e   : > { %v298_v24 = vrot.slane %v290_v8, %v277_v15  ;;  %v294_v25 = vrot.slane %v290_v8, %v273_v14  ;;  %v312_v43 = vrot.slane %v270_v16, %v1253_v4  ;;  %v316_v44 = vrot.slane %v270_v16, %v315_v6 }
  0x3f   : > { %v1279_v12 = vrot.slane %v330_v9, %v1253_v4  ;;  %v342_v13 = vrot.slane %v1270_v10, %v1253_v4  ;;  %v1289_v20 = vrot.slane %v274_v17, %v273_v14  ;;  %v286_v21 = vrot.slane %v278_v18, %v273_v14 }
  0x40   : > { %952 = vrot.lane.b32.xlu1 %v951_v11, %s1094_s7  ;;  %v306_v29 = vrot.slane %v298_v24, %v273_v14  ;;  %v1298_v30 = vrot.slane %v294_v25, %v273_v14  ;;  %v1348_v47 = vrot.slane %v312_v43, %v1253_v4  ;;  %v324_v48 = vrot.slane %v316_v44, %v1253_v4 }
  0x41   : > { %947 = vrot.lane.b32.xlu0 %v951_v11, %s1095_s12  ;;  %vm287_vm4 = vcmp.eq.s32.totalorder %v1289_v20, 1  ;;  %vm1294_vm5 = vcmp.eq.s32.totalorder %v286_v21, 1  ;;  %vm343_vm12 = vcmp.eq.s32.totalorder %v1279_v12, 1  ;;  %vm1370_vm13 = vcmp.eq.s32.totalorder %v342_v13, 1  ;;  %v353_v20 = vld [vmem:[%s1613_s5] sm:$0xf] }
  0x42   : > { %vm1320_vm6 = vcmp.eq.s32.totalorder %v306_v29, 1  ;;  %vm307_vm7 = vcmp.eq.s32.totalorder %v1298_v30, 1  ;;  %vm325_vm10 = vcmp.eq.s32.totalorder %v1348_v47, 1  ;;  %vm1354_vm11 = vcmp.eq.s32.totalorder %v324_v48, 1 }
  0xaa   : > { %v373_v22 = vpop.permute.xlu1 %372 }
  0xab   : > { %v364_v23 = vpop.permute.xlu0 %363 }
  0xae   : > { %v375_v27 = vpop.permute.xlu1 %374 }
  0xaf   : > { %v366_v28 = vpop.permute.xlu0 %365  ;;  %v377_v31 = vsel %vm376_vm2, %v373_v22, %v375_v27  ;;  %v378_v32 = vsel %vm376_vm2, %v375_v27, %v373_v22 }
  0xb0   : > { %v370_v33 = vsel %vm369_vm3, %v364_v23, %v366_v28  ;;  %v371_v34 = vsel %vm369_vm3, %v366_v28, %v364_v23 }
  0xb1   : > { %v1310_v35 = vsel %vm287_vm4, %v377_v31, %v371_v34  ;;  %v1314_v36 = vsel %vm1294_vm5, %v378_v32, %v370_v33  ;;  %v1327_v39 = vsel %vm1320_vm6, %v370_v33, %v378_v32  ;;  %v1331_v40 = vsel %vm307_vm7, %v371_v34, %v377_v31 }
  0xb2   : > { %v961_v37 = vpack.i.bf16 %v1314_v36, %v1310_v35  ;;  %v953_v45 = vpop.permute.xlu1 %952  ;;  %v435_v61 = vrot.slane %v1310_v35, 4  ;;  %v436_v0 = vrot.slane %v1314_v36, 4  ;;  %v454_v34 = vrot.slane %v1327_v39, 4 }
  0xb3   : > { %v948_v46 = vpop.permute.xlu0 %947  ;;  %v955_v49 = vunpack.i.h.bf16 %v953_v45  ;;  %v954_v50 = vunpack.i.l.bf16 %v953_v45  ;;  %v453_v35 = vrot.slane %v1331_v40, 4 }
  0xb4   : > { %962 = vrot.lane.b32.xlu1 %v961_v37, %s1094_s7  ;;  %957 = vrot.lane.b32.xlu0 %v961_v37, %s1095_s12  ;;  %v950_v51 = vunpack.i.h.bf16 %v948_v46  ;;  %v949_v52 = vunpack.i.l.bf16 %v948_v46 }
  0xb5   : > { %v411_v54 = vsel %vm394_vm9, %v954_v50, %v955_v49  ;;  %v412_v55 = vsel %vm394_vm9, %v955_v49, %v954_v50 }
  0xb6   : > { %v405_v56 = vsel %vm387_vm8, %v949_v52, %v950_v51  ;;  %v406_v57 = vsel %vm387_vm8, %v950_v51, %v949_v52 }
  0xb7   : > { %v414_v59 = vsel %vm1354_vm11, %v412_v55, %v405_v56  ;;  %v413_v60 = vsel %vm325_vm10, %v411_v54, %v406_v57  ;;  %v415_v6 = vsel %vm343_vm12, %v406_v57, %v411_v54  ;;  %v416_v8 = vsel %vm1370_vm13, %v405_v56, %v412_v55 }
  0xb8   : > { %419 = vrot.lane.b32.xlu1 %v1327_v39, %s1095_s12  ;;  %417 = vrot.lane.b32.xlu0 %v1331_v40, %s1095_s12  ;;  %v442_v9 = vrot.slane %v414_v59, 4  ;;  %v441_v10 = vrot.slane %v413_v60, 4  ;;  %v447_v31 = vrot.slane %v415_v6, 4  ;;  %v448_v32 = vrot.slane %v416_v8, 4 }
  0xba   : > { %v463_v45 = vsel %vm457_vm14, %v1265_v7, %v448_v32  ;;  %v462_v48 = vsel %vm457_vm14, %v1250_v3, %v447_v31  ;;  %v345_v7 = vld [vmem:[%s1610_s2] sm:$0xf] }
  0xbc   : > { %425 = vrot.lane.b32.xlu1 %v1327_v39, %s1094_s7  ;;  %423 = vrot.lane.b32.xlu0 %v1331_v40, %s1094_s7 }
  0xc0   : > { %350 = vperm.xlu0 %966, %v347_v42  }
 0x126   : > { %v963_v62 = vpop.permute.xlu1 %962  ;;  %v958_v63 = vpop.permute.xlu0 %957 }
 0x127   : > { %v965_v1 = vunpack.i.h.bf16 %v963_v62  ;;  %v964_v2 = vunpack.i.l.bf16 %v963_v62  ;;  %v960_v4 = vunpack.i.h.bf16 %v958_v63  ;;  %v959_v5 = vunpack.i.l.bf16 %v958_v63 }
 0x129   : > { %v395_v11 = vsel %vm394_vm9, %v964_v2, %v965_v1  ;;  %v389_v13 = vsel %vm387_vm8, %v960_v4, %v959_v5  ;;  %v388_v14 = vsel %vm387_vm8, %v959_v5, %v960_v4  ;;  %v396_v15 = vsel %vm394_vm9, %v965_v1, %v964_v2 }
 0x12a   : > { %v420_v16 = vpop.permute.xlu1 %419  ;;  %v418_v17 = vpop.permute.xlu0 %417  ;;  %v398_v18 = vsel %vm1354_vm11, %v396_v15, %v388_v14  ;;  %v400_v21 = vsel %vm1370_vm13, %v388_v14, %v396_v15  ;;  %v397_v22 = vsel %vm325_vm10, %v395_v11, %v389_v13  ;;  %v399_v23 = vsel %vm343_vm12, %v389_v13, %v395_v11 }
 0x12b   : > { %v459_v24 = vsel %vm457_vm14, %v398_v18, %v436_v0  ;;  %v461_v25 = vsel %vm457_vm14, %v400_v21, %v442_v9  ;;  %v458_v28 = vsel %vm457_vm14, %v397_v22, %v435_v61  ;;  %v460_v29 = vsel %vm457_vm14, %v399_v23, %v441_v10 }
 0x12c   : > { %v878_v27 = vpack.c.bf16 %v461_v25, %v459_v24  ;;  %v880_v33 = vpack.c.bf16 %v460_v29, %v458_v28  ;;  %v421_v41 = vsel %vm387_vm8, %v418_v17, %v420_v16  ;;  %v422_v42 = vsel %vm387_vm8, %v420_v16, %v418_v17 }
 0x12e   : > { %v426_v36 = vpop.permute.xlu1 %425  ;;  %v424_v37 = vpop.permute.xlu0 %423  ;;  %879 = vmatprep.subr.bf16.mxu0 %v878_v27 }
 0x12f   : > { %v427_v43 = vsel %vm394_vm9, %v424_v37, %v426_v36  ;;  %v428_v44 = vsel %vm394_vm9, %v426_v36, %v424_v37  ;;  %881 = vmatpush1.bf16.msra.mxu0 %v880_v33 }
 0x130   : > { %v429_v39 = vsel %vm325_vm10, %v427_v43, %v422_v42  ;;  %v430_v40 = vsel %vm1354_vm11, %v428_v44, %v421_v41  ;;  %v432_v52 = vsel %vm1370_vm13, %v421_v41, %v428_v44  ;;  %v431_v54 = vsel %vm343_vm12, %v422_v42, %v427_v43 }
 0x131   : > { %v465_v46 = vsel %vm457_vm14, %v430_v40, %v454_v34  ;;  %v464_v49 = vsel %vm457_vm14, %v429_v39, %v453_v35 }
 0x132   : > { %v882_v50 = vpack.c.bf16 %v465_v46, %v463_v45  ;;  %v884_v51 = vpack.c.bf16 %v464_v49, %v462_v48 }
 0x134   : > { %883 = vmatprep.subr.bf16.mxu0 %v882_v50 }
 0x135   : > { %885 = vmatpush1.bf16.msra.mxu0 %v884_v51 }
 0x136   : > { %865 = vmatprep.subr.msk.mxu0 %vm457_vm14, %v432_v52 }
 0x139   : > { %866 = vmatpush1.msk.msra.mxu0 %vm457_vm14, %v431_v54 }
 0x13a   : > { %867 = vmatmul.mubr.msk.f32.vlgmr.msra.gmra.mrb[0].mxu0 %vm466_vm15, %v345_v7 }
 0x13f   : > { %v351_v55 = vpop.permute.xlu0 %350 }
 0x20d   : > { %v542_v56 = vpop.f32.mrb[0].mxu0 }
 0x20e   : > { %v543_v57 = vadd.f32 %v542_v56, %v351_v55  ;;  %v544_v59 = vpop.f32.mrb[1].mxu0 }
 0x20f   : > { %v545_v60 = vadd.f32 %v544_v59, %v351_v55 }
 0x210   : > { %v547_v61 = vsel %vm457_vm14, %v543_v57, 0.0 }
 0x211   : > { %v548_v62 = vsel %vm457_vm14, %v545_v60, 0.0 }
 0x212   : > { %v549_v63 = vadd.f32 %v548_v62, %v547_v61 }
 0x214   : > { %550 = vadd.xlane.f32.xlu1 %v549_v63 }
 0x2a1   : > { %v551_v0 = vpop.xlane.xlu1 %550 }
 0x2a2   : > { %v552_v1 = vmul.f32 0.00390625, %v551_v0 }
 0x2a4   : > { %v553_v2 = vsub.f32 %v543_v57, %v552_v1  ;;  %v554_v4 = vsub.f32 %v545_v60, %v552_v1 }
 0x2a6   : > { %v555_v5 = vmul.f32 %v553_v2, %v553_v2  ;;  %v556_v6 = vmul.f32 %v554_v4, %v554_v4 }
 0x2a8   : > { %v557_v8 = vsel %vm457_vm14, %v555_v5, 0.0  ;;  %v558_v9 = vsel %vm457_vm14, %v556_v6, 0.0 }
 0x2a9   : > { %v559_v10 = vadd.f32 %v558_v9, %v557_v8 }
 0x2ab   : > { %560 = vadd.xlane.f32.xlu0 %v559_v10 }
 0x338   : > { %v561_v11 = vpop.xlane.xlu0 %560 }
 0x339   : > { %v562_v13 = vmul.f32 0.00390625, %v561_v11 }
 0x33b   : > { %v563_v14 = vadd.f32 1e-05, %v562_v13 }
 0x33d   : > { %988 = vrsqrt.f32 %v563_v14 }
 0x347   : > { %v989_v15 = vpop.eup %988 }
 0x348   : > { %v566_v16 = vmul.f32 %v989_v15, %v554_v4  ;;  %v565_v17 = vmul.f32 %v989_v15, %v553_v2 }
 0x34a   : > { %v1438_v18 = vmax.f32 %v566_v16, 0.0  ;;  %v1440_v21 = vmax.f32 %v565_v17, 0.0 }
 0x34c   : > { %571 = vrot.lane.b32.xlu0 %v1438_v18, %s1093_s8  ;;  %569 = vrot.lane.b32.xlu1 %v1440_v21, %s1093_s8  ;;  %v967_v22 = vpack.i.bf16 %v1438_v18, %v1440_v21 }
 0x350   : > { %968 = vrot.lane.b32.xlu0 %v967_v22, %s1095_s12  ;;  %575 = vrot.lane.b32.xlu1 %v1440_v21, %s1092_s20 }
 0x354   : > { %577 = vrot.lane.b32.xlu1 %v1438_v18, %s1092_s20  ;;  %s267_s20 = scalar_lea.vmem [#allocation5], %s863_s28  ;;  %s1026_s28 = sshll.u32 %s1097_s25, 4  ;;  %s1027_s28 = int_to_ptr.vmem [resolvable:$false] %s1026_s28 }
 0x355   : > { %s786_s8 = sshll.u32 %s267_s20, 4  ;;  %s1028_s15 = scalar_lea.vmem %s1027_s28, 256  ;;  %s1566_s8 = int_to_ptr.vmem [resolvable:$true] %s786_s8 }
 0x356   : > { %s1022_s14 = scalar_lea.vmem %s1566_s8, 128  ;;  %p1029_p7 = scmp.lt.s32.totalorder %s1566_s8, %s1027_s28 }
 0x357   : > { %p1023_p6 = scmp.ne.s32.totalorder %s1566_s8, %s1022_s14  ;;  %p1030_p10 = scmp.lt.s32.totalorder %s1028_s15, %s1022_s14 }
 0x358   : > { %973 = vrot.lane.b32.xlu1 %v967_v22, %s1094_s7 }
 0x359   : > { %p1024_p12 = pnand %p1023_p6, %p1631_p11  ;;  %p1031_p2 = por %p1030_p10, %p1029_p7 }
 0x35b   : > { %p1025_p13 = pneg %p1024_p12 }
 0x35d   : > { %p1032_p4 = pnand %p1031_p2, %p1025_p13 }
 0x3be   : > { %v570_v23 = vpop.permute.xlu1 %569  ;;  %v572_v25 = vpop.permute.xlu0 %571 }
 0x3bf   : > { %v573_v28 = vsel %vm369_vm3, %v570_v23, %v572_v25  ;;  %v574_v29 = vsel %vm369_vm3, %v572_v25, %v570_v23 }
 0x3c2   : > { %v576_v24 = vpop.permute.xlu1 %575  ;;  %v969_v30 = vpop.permute.xlu0 %968 }
 0x3c3   : > { %v971_v42 = vunpack.i.h.bf16 %v969_v30  ;;  %v970_v43 = vunpack.i.l.bf16 %v969_v30 }
 0x3c5   : > { %v605_v40 = vsel %vm387_vm8, %v970_v43, %v971_v42  ;;  %v606_v45 = vsel %vm387_vm8, %v971_v42, %v970_v43 }
 0x3c6   : > { %v578_v27 = vpop.permute.xlu1 %577 }
 0x3c7   : > { %v579_v31 = vsel %vm376_vm2, %v576_v24, %v578_v27  ;;  %v580_v32 = vsel %vm376_vm2, %v578_v27, %v576_v24 }
 0x3c8   : > { %v581_v33 = vsel %vm287_vm4, %v579_v31, %v574_v29  ;;  %v582_v34 = vsel %vm1294_vm5, %v580_v32, %v573_v28  ;;  %v1470_v36 = vsel %vm1320_vm6, %v573_v28, %v580_v32  ;;  %v1474_v37 = vsel %vm307_vm7, %v574_v29, %v579_v31 }
 0x3c9   : > { %v982_v35 = vpack.i.bf16 %v582_v34, %v581_v33  ;;  %v635_v49 = vrot.slane %v581_v33, 4  ;;  %v636_v52 = vrot.slane %v582_v34, 4  ;;  %v654_v23 = vrot.slane %v1470_v36, 4 }
 0x3ca   : > { %v974_v26 = vpop.permute.xlu1 %973  ;;  %v653_v24 = vrot.slane %v1474_v37, 4 }
 0x3cb   : > { %983 = vrot.lane.b32.xlu1 %v982_v35, %s1094_s7  ;;  %978 = vrot.lane.b32.xlu0 %v982_v35, %s1095_s12  ;;  %v976_v38 = vunpack.i.h.bf16 %v974_v26  ;;  %v975_v41 = vunpack.i.l.bf16 %v974_v26 }
 0x3cd   : > { %v611_v44 = vsel %vm394_vm9, %v975_v41, %v976_v38  ;;  %v612_v39 = vsel %vm394_vm9, %v976_v38, %v975_v41 }
 0x3ce   : > { %v614_v46 = vsel %vm1354_vm11, %v612_v39, %v605_v40  ;;  %v613_v48 = vsel %vm325_vm10, %v611_v44, %v606_v45  ;;  %v615_v57 = vsel %vm343_vm12, %v606_v45, %v611_v44  ;;  %v616_v59 = vsel %vm1370_vm13, %v605_v40, %v612_v39 }
 0x3cf   : > { %619 = vrot.lane.b32.xlu1 %v1470_v36, %s1095_s12  ;;  %617 = vrot.lane.b32.xlu0 %v1474_v37, %s1095_s12  ;;  %v642_v60 = vrot.slane %v614_v46, 4  ;;  %v641_v61 = vrot.slane %v613_v48, 4  ;;  %v647_v16 = vrot.slane %v615_v57, 4  ;;  %v648_v17 = vrot.slane %v616_v59, 4 }
 0x3d1   : > { %v662_v35 = vsel %vm457_vm14, %v1438_v18, %v648_v17 }
 0x3d3   : > { %625 = vrot.lane.b32.xlu1 %v1470_v36, %s1094_s7  ;;  %623 = vrot.lane.b32.xlu0 %v1474_v37, %s1094_s7  ;;  %v661_v37 = vsel %vm457_vm14, %v1440_v21, %v647_v16 }
 0x3d7   : > { %356 = vperm.xlu0 %966, %v353_v20  }
 0x43d   : > { %v979_v50 = vpop.permute.xlu0 %978  ;;  %v984_v51 = vpop.permute.xlu1 %983 }
 0x43e   : > { %v981_v7 = vunpack.i.h.bf16 %v979_v50  ;;  %v980_v54 = vunpack.i.l.bf16 %v979_v50  ;;  %v986_v55 = vunpack.i.h.bf16 %v984_v51  ;;  %v985_v56 = vunpack.i.l.bf16 %v984_v51 }
 0x440   : > { %v590_v62 = vsel %vm387_vm8, %v981_v7, %v980_v54  ;;  %v595_v63 = vsel %vm394_vm9, %v985_v56, %v986_v55  ;;  %v589_v0 = vsel %vm387_vm8, %v980_v54, %v981_v7  ;;  %v596_v1 = vsel %vm394_vm9, %v986_v55, %v985_v56 }
 0x441   : > { %v618_v2 = vpop.permute.xlu0 %617  ;;  %v620_v4 = vpop.permute.xlu1 %619  ;;  %v598_v5 = vsel %vm1354_vm11, %v596_v1, %v589_v0  ;;  %v600_v6 = vsel %vm1370_vm13, %v589_v0, %v596_v1  ;;  %v597_v8 = vsel %vm325_vm10, %v595_v63, %v590_v62  ;;  %v599_v9 = vsel %vm343_vm12, %v590_v62, %v595_v63 }
 0x442   : > { %v658_v10 = vsel %vm457_vm14, %v598_v5, %v636_v52  ;;  %v660_v11 = vsel %vm457_vm14, %v600_v6, %v642_v60  ;;  %v657_v14 = vsel %vm457_vm14, %v597_v8, %v635_v49  ;;  %v659_v15 = vsel %vm457_vm14, %v599_v9, %v641_v61 }
 0x443   : > { %v886_v13 = vpack.c.bf16 %v660_v11, %v658_v10  ;;  %v888_v22 = vpack.c.bf16 %v659_v15, %v657_v14  ;;  %v621_v28 = vsel %vm387_vm8, %v618_v2, %v620_v4  ;;  %v622_v29 = vsel %vm387_vm8, %v620_v4, %v618_v2 }
 0x445   : > { %v624_v25 = vpop.permute.xlu0 %623  ;;  %v626_v27 = vpop.permute.xlu1 %625  ;;  %887 = vmatprep.subr.bf16.mxu1 %v886_v13 }
 0x446   : > { %v627_v31 = vsel %vm394_vm9, %v624_v25, %v626_v27  ;;  %v628_v32 = vsel %vm394_vm9, %v626_v27, %v624_v25  ;;  %889 = vmatpush1.bf16.msra.mxu1 %v888_v22 }
 0x447   : > { %v629_v33 = vsel %vm325_vm10, %v627_v31, %v622_v29  ;;  %v630_v34 = vsel %vm1354_vm11, %v628_v32, %v621_v28  ;;  %v632_v47 = vsel %vm1370_vm13, %v621_v28, %v628_v32  ;;  %v631_v18 = vsel %vm343_vm12, %v622_v29, %v627_v31 }
 0x448   : > { %v664_v36 = vsel %vm457_vm14, %v630_v34, %v654_v23  ;;  %v663_v20 = vsel %vm457_vm14, %v629_v33, %v653_v24 }
 0x449   : > { %v890_v26 = vpack.c.bf16 %v664_v36, %v662_v35  ;;  %v892_v19 = vpack.c.bf16 %v663_v20, %v661_v37 }
 0x44b   : > { %891 = vmatprep.subr.bf16.mxu1 %v890_v26 }
 0x44c   : > { %893 = vmatpush1.bf16.msra.mxu1 %v892_v19 }
 0x44d   : > { %868 = vmatprep.subr.msk.mxu1 %vm457_vm14, %v632_v47 }
 0x450   : > { %869 = vmatpush1.msk.msra.mxu1 %vm457_vm14, %v631_v18 }
 0x451   : > { %870 = vmatmul.mubr.msk.f32.vlgmr.msra.gmra.mrb[0].mxu1 %vm466_vm15, %v346_v53 }
 0x456   : > { %v357_v21 = vpop.permute.xlu0 %356 }
 0x524   : > { %v740_v30 = vpop.f32.mrb[0].mxu1 }
 0x525   : > { %v741_v38 = vadd.f32 %v740_v30, %v357_v21  ;;  %v742_v41 = vpop.f32.mrb[1].mxu1 }
 0x526   : > { %v743_v42 = vadd.f32 %v742_v41, %v357_v21 }
 0x527   : > { %v745_v58 = vsel %vm457_vm14, %v741_v38, 0.0 }
 0x528   : > { %v746_v43 = vsel %vm457_vm14, %v743_v42, 0.0 }
 0x529   : > { %v747_v44 = vadd.f32 %v746_v43, %v745_v58 }
 0x52b   : > { %748 = vadd.xlane.f32.xlu1 %v747_v44 }
 0x5b8   : > { %v749_v39 = vpop.xlane.xlu1 %748 }
 0x5b9   : > { %v750_v40 = vmul.f32 0.00390625, %v749_v39 }
 0x5bb   : > { %v751_v12 = vsub.f32 %v741_v38, %v750_v40  ;;  %v752_v45 = vsub.f32 %v743_v42, %v750_v40 }
 0x5bd   : > { %v753_v46 = vmul.f32 %v751_v12, %v751_v12  ;;  %v754_v48 = vmul.f32 %v752_v45, %v752_v45 }
 0x5bf   : > { %v755_v49 = vsel %vm457_vm14, %v753_v46, 0.0  ;;  %v756_v50 = vsel %vm457_vm14, %v754_v48, 0.0 }
 0x5c0   : > { %v757_v51 = vadd.f32 %v756_v50, %v755_v49 }
 0x5c2   : > { %758 = vadd.xlane.f32.xlu0 %v757_v51 }
 0x64f   : > { %v759_v52 = vpop.xlane.xlu0 %758 }
 0x650   : > { %v760_v7 = vmul.f32 0.00390625, %v759_v52 }
 0x652   : > { %v761_v54 = vadd.f32 1e-05, %v760_v7 }
 0x654   : > { %990 = vrsqrt.f32 %v761_v54 }
 0x65e   : > { %v991_v55 = vpop.eup %990 }
 0x65f   : > { %v763_v56 = vmul.f32 %v991_v55, %v751_v12  ;;  %v764_v57 = vmul.f32 %v991_v55, %v752_v45 }
 0x661   : > { %v767_v59 = vcombine.low %v763_v56, %v764_v57 }
 0x663   : > { %v769_v60 = vadd.f32 %v767_v59, %v1250_v3 }
 0x665   : > { %770 = vst [vmem:[%s267_s20] sm:$0xff] %v769_v60 }
 0x666   : > { %1035 = shalt.err (!%p1032_p4)
}
 0x667   : > { %s1036_s26 = scalar_lea.hbm %s1564_s13, 128  ;;  %s1040_s19 = scalar_lea.hbm %s1614_s6, 256 }
 0x668   : > { %p1037_p5 = scmp.ne.s32.totalorder %s1564_s13, %s1036_s26  ;;  %p1041_p0 = scmp.lt.u32.totalorder %s1564_s13, %s1614_s6 }
 0x669   : > { %p1042_p1 = scmp.lt.u32.totalorder %s1040_s19, %s1036_s26  ;;  %p1044_p6 = scmp.lt.u32.totalorder %s1036_s26, %s1564_s13 }
 0x66a   : > { %p1038_p8 = pnand %p1037_p5, %p1631_p11 }
 0x66b   : > { %p1043_p3 = por %p1042_p1, %p1041_p0 }
 0x66c   : > { %p1039_p9 = pneg %p1038_p8 }
 0x66d   : > { %p1045_p12 = por %p1044_p6, %p1043_p3 }
 0x66f   : > { %p1046_p13 = pnand %p1045_p12, %p1039_p9 }
 0x671   : > { %1049 = shalt.err (!%p1046_p13)
}
 0x672   : > { %896 = dma.vmem_to_hbm [thread:$0]  (%p1631_p11), %s1566_s8, 128, %s1564_s13, %s772_s11  }
 0x673 PF: > { %s798_s20 = sand.u32 1, %s1076_s21   ;;  %p1632_p7 = scmp.ne.s32.totalorder %s1619_s10, 0 }
 0x674   : > { %p1633_p10 = scmp.ge.s32.totalorder %s1088_s24, 2  ;;  %s799_s7 = scalar_lea.sflag [#allocation4], %s798_s20 }
 0x676   : > { %p903_p2 = pnand %p1633_p10, %p1632_p7 }
 0x678   : > { %1071 = dma.done.wait (!%p903_p2), %s799_s7, 128  }
 0x679   : > { %1073 = vsyncadd (!%p903_p2), %s799_s7, 4294967168  ;;  %p19_p4 = scmp.ge.s32.totalorder %s1158_s27, 4   ;;  %s1634_s21 = smov %s1080_s22 }
 0x67a   : > { %s1635_s22 = smov %s1084_s23  ;;  %s1636_s23 = smov %s1170_s30 }
 0x67b   : > { %s1637_s24 = smov %s1158_s27  ;;  %21 = sbr.rel (!%p19_p4) target bundleno = 5 (0x5), region = 89 }
 0x682   :  { %804 = vsyncpa [#allocation3], 1 }
 0x683   :  { %806 = vsyncpa [#allocation3 + $0x1], 1 }
 0x684   :  { %807 = vsyncpa [#allocation4], 1 }
 0x685   :  { %809 = vsyncpa [#allocation4 + $0x1], 1 }

// kernel: tpu_custom_call.1
= control target key start
LH: loop header
LB: loop body
LE: loop exit
PB: predicated region body
PF: predicated region fallthrough
CT: control target
= control target key end

     0   :  { %11 = vsyncpa [#allocation3], 0  ;;  %s1608_s0 = inlined_call_operand.hbm [shape: f32[2,4,256], index: 0, kind: input, shape index: {}]   ;;  %s1609_s1 = inlined_call_operand.vmem [shape: s32[2,256], index: 1, kind: input, shape index: {}]   ;;  %s1610_s2 = inlined_call_operand.vmem [shape: f32[4,36], index: 2, kind: input, shape index: {}]   ;;  %s1611_s3 = inlined_call_operand.vmem [shape: f32[4,1], index: 3, kind: input, shape index: {}]   ;;  %s1612_s4 = inlined_call_operand.vmem [shape: f32[4,36], index: 4, kind: input, shape index: {}]   ;;  %s1613_s5 = inlined_call_operand.vmem [shape: f32[4,1], index: 5, kind: input, shape index: {}]   ;;  %s1614_s6 = inlined_call_operand.hbm [shape: f32[2,4,256], index: 6, kind: output, shape index: {}]  }
   0x1   :  { %13 = vsyncpa [#allocation3 + $0x1], 0 }
   0x2   :  { %14 = vsyncpa [#allocation4], 0 }
   0x3   :  { %16 = vsyncpa [#allocation4 + $0x1], 0  ;;  %s1133_s21 = smov 0   ;;  %s1135_s22 = smov 0  }
   0x4   :  { %s1137_s23 = smov 0   ;;  %s1139_s24 = smov 0  }
   0x5 LB: > { %s1154_s25 = sadd.s32 4294967295, %s1088_s24   ;;  %s856_s26 = sadd.s32 4294967294, %s1088_s24   ;;  %s1088_s24 = sphi %s1139_s24, %s1637_s24   ;;  %s1084_s23 = sphi %s1137_s23, %s1636_s23   ;;  %s1080_s22 = sphi %s1135_s22, %s1635_s22   ;;  %s1076_s21 = sphi %s1133_s21, %s1634_s21  }
   0x6   : > { %s1158_s27 = sadd.s32 1, %s1088_s24   ;;  %s29_s28 = sadd.s32 1, %s1084_s23 }
   0x7   : > { %s26_s29 = ssub.s32 %s1088_s24, %s1158_s27  ;;  %p36_p0 = scmp.ne.s32.totalorder %s1084_s23, %s1080_s22 }
   0x8   : > { %p27_p1 = scmp.eq.s32.totalorder %s26_s29, 0  ;;  %p37_p2 = scmp.eq.s32.totalorder %s1088_s24, 0 }
   0x9   : > { %p42_p3 = scmp.ne.s32.totalorder %s1080_s22, %s1076_s21  ;;  %p43_p4 = scmp.eq.s32.totalorder %s1154_s25, 0 }
   0xa   : > { %s1170_s30 = scalar_select %p27_p1, %s1084_s23, %s29_s28  }
   0xb   : > { %p1172_p5 = por %p37_p2, %p36_p0  ;;  %p1176_p6 = por %p43_p4, %p42_p3 }
   0xc   : > { %p171_p7 = scmp.eq.s32.totalorder %s1154_s25, 1  ;;  %p177_p8 = scmp.eq.s32.totalorder %s856_s26, 1 }
   0xd   : > { %p906_p10 = scmp.lt.s32.totalorder %s1088_s24, 2  ;;  %s212_s11 = sand.u32 1, %s1084_s23  }
   0xe   : > { %p1183_p11 = por %p171_p7, %p36_p0  ;;  %p1187_p12 = por %p177_p8, %p42_p3 }
   0xf   : > { %s876_s12 = sshll.u32 %s1088_s24, 7  ;;  %s859_s13 = sshll.u32 %s212_s11, 3 }
  0x10   : > { %s1618_s9 = scalar_select %p1183_p11, 1, 0 }
  0x11   : > { %s1619_s10 = scalar_select %p1187_p12, 1, 0 }
  0x12   : > { %s1196_s16 = scalar_lea.hbm %s1608_s0, %s876_s12  ;;  %s216_s17 = scalar_lea.vmem [#allocation2], %s859_s13 }
  0x13   : > { %s224_s18 = sshll.u32 %s216_s17, 4  ;;  %p1200_p13 = pnand %p906_p10, %p1172_p5  ;;  %s1204_s18 = int_to_ptr.vmem [resolvable:$true] %s224_s18 }
  0x14   : > { %s213_s20 = scalar_lea.sflag [#allocation3], %s212_s11  ;;  %s992_s26 = scalar_lea.hbm %s1196_s16, 128 }
  0x15   : > { %p993_p2 = scmp.ne.s32.totalorder %s1196_s16, %s992_s26  ;;  %p994_p3 = pneg %p1200_p13 }
  0x16   : > { %s997_s7 = scalar_lea.hbm %s1608_s0, 256  ;;  %p998_p5 = scmp.lt.u32.totalorder %s1196_s16, %s1608_s0 }
  0x17   : > { %p995_p4 = pnand %p994_p3, %p993_p2  ;;  %p999_p8 = scmp.lt.u32.totalorder %s997_s7, %s992_s26 }
  0x18   : > { %p1001_p9 = scmp.lt.u32.totalorder %s992_s26, %s1196_s16 }
  0x19   : > { %p996_p7 = pneg %p995_p4  ;;  %p1000_p10 = por %p999_p8, %p998_p5 }
  0x1b   : > { %p1002_p0 = por %p1001_p9, %p1000_p10 }
  0x1d   : > { %p1003_p1 = pnand %p1002_p0, %p996_p7 }
  0x1f   : > { %1006 = shalt.err (!%p1003_p1)
}
  0x20   : > { %s1007_s11 = scalar_lea.vmem %s1204_s18, 128  ;;  %s1090_s14 = smov [#allocation2]  }
  0x21   : > { %p1008_p2 = scmp.ne.s32.totalorder %s1204_s18, %s1007_s11  ;;  %s1012_s15 = sshll.u32 %s1090_s14, 4  ;;  %s1013_s15 = int_to_ptr.vmem [resolvable:$false] %s1012_s15 }
  0x22   : > { %s1014_s17 = scalar_lea.vmem %s1013_s15, 256  ;;  %p1015_p11 = scmp.lt.s32.totalorder %s1204_s18, %s1013_s15 }
  0x23   : > { %p1010_p4 = pnand %p1008_p2, %p994_p3  ;;  %p1016_p5 = scmp.lt.s32.totalorder %s1014_s17, %s1007_s11 }
  0x25   : > { %p1011_p12 = pneg %p1010_p4  ;;  %p1017_p8 = por %p1016_p5, %p1015_p11 }
  0x27   : > { %p1018_p9 = pnand %p1017_p8, %p1011_p12 }
  0x29   : > { %1021 = shalt.err (!%p1018_p9)
}
  0x2a   : > { %901 = dma.hbm_to_vmem [thread:$0]  (!%p1200_p13), %s1196_s16, 128, %s1204_s18, %s213_s20  }
  0x2b   : > { %p1621_p0 = scmp.lt.s32.totalorder %s1088_s24, 3  ;;  %p1622_p1 = scmp.ge.s32.totalorder %s1088_s24, 1 }
  0x2d   : > { %p230_p3 = pnand %p1622_p1, %p1621_p0 }
  0x2e   : > { %s1238_s26 = sand.u32 (!%p230_p3), 1, %s1080_s22  }
  0x2f   : > { %233 = sbr.rel (%p230_p3) target bundleno = 1651 (0x673), region = 44  ;;  %s863_s28 = sshll.u32 (!%p230_p3), %s1238_s26, 3 }
  0x30   : > { %s236_s29 = scalar_lea.sflag (!%p230_p3), [#allocation3], %s1238_s26  ;;  %s239_s19 = scalar_lea.vmem (!%p230_p3), [#allocation2], %s863_s28 }
  0x36   : > { %1067 = dma.done.wait (%p1176_p6), %s236_s29, 128  }
  0x37   : > { %1069 = vsyncadd (%p1176_p6), %s236_s29, 4294967168  ;;  %v271_v0 = vlaneseq  ;;  %v1091_v1 = vmov 0   ;;  %v1250_v3 = vld [vmem:[%s239_s19] sm:$0xff]  ;;  %s1092_s20 = smov 112   ;;  %s1093_s8 = smov 16   ;;  %v1096_v41 = vmov 0.0  }
  0x38   : > { %966 = vset.pattern.permute.xlu0 %v1091_v1  ;;  %v268_v5 = vld [vmem:[%s1609_s1] sm:$0xf]  ;;  %372 = vrot.lane.b32.xlu1 %v1250_v3, %s1092_s20  ;;  %v1265_v7 = vcombine.high %v1250_v3, %v1250_v3  ;;  %s1094_s7 = smov 127   ;;  %s1095_s12 = smov 1   ;;  %vm457_vm14 = vcmask 1043456   ;;  %vm466_vm15 = vcmask 293888  }
  0x39   : > { %v1248_v2 = vshrl.u32 %v271_v0, 7  ;;  %363 = vrot.lane.b32.xlu0 %v1250_v3, %s1093_s8  ;;  %vm289_vm0 = vcmp.eq.s32.totalorder %v268_v5, 15  ;;  %vm269_vm1 = vcmp.eq.s32.totalorder %v268_v5, 0  ;;  %v1287_v19 = vand.u32 127, %v271_v0  ;;  %540 = vmatprep.mubr.f32.mxu0 %v1096_v41  ;;  %v347_v42 = vld [vmem:[%s1611_s3] sm:$0xf] }
  0x3a   : > { %v290_v8 = vsel %vm289_vm0, 1, %v1091_v1  ;;  %v951_v11 = vpack.i.bf16 %v1265_v7, %v1250_v3  ;;  %v270_v16 = vsel %vm269_vm1, 1, %v1091_v1  ;;  %738 = vmatprep.mubr.f32.mxu1 %v1096_v41  ;;  %v346_v53 = vld [vmem:[%s1612_s4] sm:$0xf]  ;;  %s877_s18 = sshll.u32 %s1154_s25, 7  ;;  %s772_s11 = scalar_lea.sflag [#allocation4], %s1238_s26 }
  0x3b   : > { %v1253_v4 = vsub.s32 1, %v1248_v2  ;;  %v315_v6 = vsub.s32 3, %v1248_v2  ;;  %v273_v14 = vsub.s32 0, %v1248_v2  ;;  %v277_v15 = vsub.s32 2, %v1248_v2  ;;  %s1564_s13 = scalar_lea.hbm %s1614_s6, %s877_s18  ;;  %p1631_p11 = scmp.ne.s32.totalorder %s1618_s9, 0 }
  0x3c   : > { %374 = vrot.lane.b32.xlu1 %v1265_v7, %s1092_s20  ;;  %vm376_vm2 = vcmp.lt.s32.totalorder %v1287_v19, 112  ;;  %vm369_vm3 = vcmp.lt.s32.totalorder %v1287_v19, 16  ;;  %vm387_vm8 = vcmp.lt.s32.totalorder %v1287_v19, 1  ;;  %vm394_vm9 = vcmp.lt.s32.totalorder %v1287_v19, 127  ;;  %s1097_s25 = smov [#allocation5]  }
  0x3d   : > { %v330_v9 = vrot.slane %v290_v8, %v1253_v4  ;;  %v1270_v10 = vrot.slane %v290_v8, %v315_v6  ;;  %365 = vrot.lane.b32.xlu0 %v1265_v7, %s1093_s8  ;;  %v274_v17 = vrot.slane %v270_v16, %v273_v14  ;;  %v278_v18 = vrot.slane %v270_v16, %v277_v15 }
  0x3e   : > { %v298_v24 = vrot.slane %v290_v8, %v277_v15  ;;  %v294_v25 = vrot.slane %v290_v8, %v273_v14  ;;  %v312_v43 = vrot.slane %v270_v16, %v1253_v4  ;;  %v316_v44 = vrot.slane %v270_v16, %v315_v6 }
  0x3f   : > { %v1279_v12 = vrot.slane %v330_v9, %v1253_v4  ;;  %v342_v13 = vrot.slane %v1270_v10, %v1253_v4  ;;  %v1289_v20 = vrot.slane %v274_v17, %v273_v14  ;;  %v286_v21 = vrot.slane %v278_v18, %v273_v14 }
  0x40   : > { %952 = vrot.lane.b32.xlu1 %v951_v11, %s1094_s7  ;;  %v306_v29 = vrot.slane %v298_v24, %v273_v14  ;;  %v1298_v30 = vrot.slane %v294_v25, %v273_v14  ;;  %v1348_v47 = vrot.slane %v312_v43, %v1253_v4  ;;  %v324_v48 = vrot.slane %v316_v44, %v1253_v4 }
  0x41   : > { %947 = vrot.lane.b32.xlu0 %v951_v11, %s1095_s12  ;;  %vm287_vm4 = vcmp.eq.s32.totalorder %v1289_v20, 1  ;;  %vm1294_vm5 = vcmp.eq.s32.totalorder %v286_v21, 1  ;;  %vm343_vm12 = vcmp.eq.s32.totalorder %v1279_v12, 1  ;;  %vm1370_vm13 = vcmp.eq.s32.totalorder %v342_v13, 1  ;;  %v353_v20 = vld [vmem:[%s1613_s5] sm:$0xf] }
  0x42   : > { %vm1320_vm6 = vcmp.eq.s32.totalorder %v306_v29, 1  ;;  %vm307_vm7 = vcmp.eq.s32.totalorder %v1298_v30, 1  ;;  %vm325_vm10 = vcmp.eq.s32.totalorder %v1348_v47, 1  ;;  %vm1354_vm11 = vcmp.eq.s32.totalorder %v324_v48, 1 }
  0xaa   : > { %v373_v22 = vpop.permute.xlu1 %372 }
  0xab   : > { %v364_v23 = vpop.permute.xlu0 %363 }
  0xae   : > { %v375_v27 = vpop.permute.xlu1 %374 }
  0xaf   : > { %v366_v28 = vpop.permute.xlu0 %365  ;;  %v377_v31 = vsel %vm376_vm2, %v373_v22, %v375_v27  ;;  %v378_v32 = vsel %vm376_vm2, %v375_v27, %v373_v22 }
  0xb0   : > { %v370_v33 = vsel %vm369_vm3, %v364_v23, %v366_v28  ;;  %v371_v34 = vsel %vm369_vm3, %v366_v28, %v364_v23 }
  0xb1   : > { %v1310_v35 = vsel %vm287_vm4, %v377_v31, %v371_v34  ;;  %v1314_v36 = vsel %vm1294_vm5, %v378_v32, %v370_v33  ;;  %v1327_v39 = vsel %vm1320_vm6, %v370_v33, %v378_v32  ;;  %v1331_v40 = vsel %vm307_vm7, %v371_v34, %v377_v31 }
  0xb2   : > { %v961_v37 = vpack.i.bf16 %v1314_v36, %v1310_v35  ;;  %v953_v45 = vpop.permute.xlu1 %952  ;;  %v435_v61 = vrot.slane %v1310_v35, 4  ;;  %v436_v0 = vrot.slane %v1314_v36, 4  ;;  %v454_v34 = vrot.slane %v1327_v39, 4 }
  0xb3   : > { %v948_v46 = vpop.permute.xlu0 %947  ;;  %v955_v49 = vunpack.i.h.bf16 %v953_v45  ;;  %v954_v50 = vunpack.i.l.bf16 %v953_v45  ;;  %v453_v35 = vrot.slane %v1331_v40, 4 }
  0xb4   : > { %962 = vrot.lane.b32.xlu1 %v961_v37, %s1094_s7  ;;  %957 = vrot.lane.b32.xlu0 %v961_v37, %s1095_s12  ;;  %v950_v51 = vunpack.i.h.bf16 %v948_v46  ;;  %v949_v52 = vunpack.i.l.bf16 %v948_v46 }
  0xb5   : > { %v411_v54 = vsel %vm394_vm9, %v954_v50, %v955_v49  ;;  %v412_v55 = vsel %vm394_vm9, %v955_v49, %v954_v50 }
  0xb6   : > { %v405_v56 = vsel %vm387_vm8, %v949_v52, %v950_v51  ;;  %v406_v57 = vsel %vm387_vm8, %v950_v51, %v949_v52 }
  0xb7   : > { %v414_v59 = vsel %vm1354_vm11, %v412_v55, %v405_v56  ;;  %v413_v60 = vsel %vm325_vm10, %v411_v54, %v406_v57  ;;  %v415_v6 = vsel %vm343_vm12, %v406_v57, %v411_v54  ;;  %v416_v8 = vsel %vm1370_vm13, %v405_v56, %v412_v55 }
  0xb8   : > { %419 = vrot.lane.b32.xlu1 %v1327_v39, %s1095_s12  ;;  %417 = vrot.lane.b32.xlu0 %v1331_v40, %s1095_s12  ;;  %v442_v9 = vrot.slane %v414_v59, 4  ;;  %v441_v10 = vrot.slane %v413_v60, 4  ;;  %v447_v31 = vrot.slane %v415_v6, 4  ;;  %v448_v32 = vrot.slane %v416_v8, 4 }
  0xba   : > { %v463_v45 = vsel %vm457_vm14, %v1265_v7, %v448_v32  ;;  %v462_v48 = vsel %vm457_vm14, %v1250_v3, %v447_v31  ;;  %v345_v7 = vld [vmem:[%s1610_s2] sm:$0xf] }
  0xbc   : > { %425 = vrot.lane.b32.xlu1 %v1327_v39, %s1094_s7  ;;  %423 = vrot.lane.b32.xlu0 %v1331_v40, %s1094_s7 }
  0xc0   : > { %350 = vperm.xlu0 %966, %v347_v42  }
 0x126   : > { %v963_v62 = vpop.permute.xlu1 %962  ;;  %v958_v63 = vpop.permute.xlu0 %957 }
 0x127   : > { %v965_v1 = vunpack.i.h.bf16 %v963_v62  ;;  %v964_v2 = vunpack.i.l.bf16 %v963_v62  ;;  %v960_v4 = vunpack.i.h.bf16 %v958_v63  ;;  %v959_v5 = vunpack.i.l.bf16 %v958_v63 }
 0x129   : > { %v395_v11 = vsel %vm394_vm9, %v964_v2, %v965_v1  ;;  %v389_v13 = vsel %vm387_vm8, %v960_v4, %v959_v5  ;;  %v388_v14 = vsel %vm387_vm8, %v959_v5, %v960_v4  ;;  %v396_v15 = vsel %vm394_vm9, %v965_v1, %v964_v2 }
 0x12a   : > { %v420_v16 = vpop.permute.xlu1 %419  ;;  %v418_v17 = vpop.permute.xlu0 %417  ;;  %v398_v18 = vsel %vm1354_vm11, %v396_v15, %v388_v14  ;;  %v400_v21 = vsel %vm1370_vm13, %v388_v14, %v396_v15  ;;  %v397_v22 = vsel %vm325_vm10, %v395_v11, %v389_v13  ;;  %v399_v23 = vsel %vm343_vm12, %v389_v13, %v395_v11 }
 0x12b   : > { %v459_v24 = vsel %vm457_vm14, %v398_v18, %v436_v0  ;;  %v461_v25 = vsel %vm457_vm14, %v400_v21, %v442_v9  ;;  %v458_v28 = vsel %vm457_vm14, %v397_v22, %v435_v61  ;;  %v460_v29 = vsel %vm457_vm14, %v399_v23, %v441_v10 }
 0x12c   : > { %v878_v27 = vpack.c.bf16 %v461_v25, %v459_v24  ;;  %v880_v33 = vpack.c.bf16 %v460_v29, %v458_v28  ;;  %v421_v41 = vsel %vm387_vm8, %v418_v17, %v420_v16  ;;  %v422_v42 = vsel %vm387_vm8, %v420_v16, %v418_v17 }
 0x12e   : > { %v426_v36 = vpop.permute.xlu1 %425  ;;  %v424_v37 = vpop.permute.xlu0 %423  ;;  %879 = vmatprep.subr.bf16.mxu0 %v878_v27 }
 0x12f   : > { %v427_v43 = vsel %vm394_vm9, %v424_v37, %v426_v36  ;;  %v428_v44 = vsel %vm394_vm9, %v426_v36, %v424_v37  ;;  %881 = vmatpush1.bf16.msra.mxu0 %v880_v33 }
 0x130   : > { %v429_v39 = vsel %vm325_vm10, %v427_v43, %v422_v42  ;;  %v430_v40 = vsel %vm1354_vm11, %v428_v44, %v421_v41  ;;  %v432_v52 = vsel %vm1370_vm13, %v421_v41, %v428_v44  ;;  %v431_v54 = vsel %vm343_vm12, %v422_v42, %v427_v43 }
 0x131   : > { %v465_v46 = vsel %vm457_vm14, %v430_v40, %v454_v34  ;;  %v464_v49 = vsel %vm457_vm14, %v429_v39, %v453_v35 }
 0x132   : > { %v882_v50 = vpack.c.bf16 %v465_v46, %v463_v45  ;;  %v884_v51 = vpack.c.bf16 %v464_v49, %v462_v48 }
 0x134   : > { %883 = vmatprep.subr.bf16.mxu0 %v882_v50 }
 0x135   : > { %885 = vmatpush1.bf16.msra.mxu0 %v884_v51 }
 0x136   : > { %865 = vmatprep.subr.msk.mxu0 %vm457_vm14, %v432_v52 }
 0x139   : > { %866 = vmatpush1.msk.msra.mxu0 %vm457_vm14, %v431_v54 }
 0x13a   : > { %867 = vmatmul.mubr.msk.f32.vlgmr.msra.gmra.mrb[0].mxu0 %vm466_vm15, %v345_v7 }
 0x13f   : > { %v351_v55 = vpop.permute.xlu0 %350 }
 0x20d   : > { %v542_v56 = vpop.f32.mrb[0].mxu0 }
 0x20e   : > { %v543_v57 = vadd.f32 %v542_v56, %v351_v55  ;;  %v544_v59 = vpop.f32.mrb[1].mxu0 }
 0x20f   : > { %v545_v60 = vadd.f32 %v544_v59, %v351_v55 }
 0x210   : > { %v547_v61 = vsel %vm457_vm14, %v543_v57, 0.0 }
 0x211   : > { %v548_v62 = vsel %vm457_vm14, %v545_v60, 0.0 }
 0x212   : > { %v549_v63 = vadd.f32 %v548_v62, %v547_v61 }
 0x214   : > { %550 = vadd.xlane.f32.xlu1 %v549_v63 }
 0x2a1   : > { %v551_v0 = vpop.xlane.xlu1 %550 }
 0x2a2   : > { %v552_v1 = vmul.f32 0.00390625, %v551_v0 }
 0x2a4   : > { %v553_v2 = vsub.f32 %v543_v57, %v552_v1  ;;  %v554_v4 = vsub.f32 %v545_v60, %v552_v1 }
 0x2a6   : > { %v555_v5 = vmul.f32 %v553_v2, %v553_v2  ;;  %v556_v6 = vmul.f32 %v554_v4, %v554_v4 }
 0x2a8   : > { %v557_v8 = vsel %vm457_vm14, %v555_v5, 0.0  ;;  %v558_v9 = vsel %vm457_vm14, %v556_v6, 0.0 }
 0x2a9   : > { %v559_v10 = vadd.f32 %v558_v9, %v557_v8 }
 0x2ab   : > { %560 = vadd.xlane.f32.xlu0 %v559_v10 }
 0x338   : > { %v561_v11 = vpop.xlane.xlu0 %560 }
 0x339   : > { %v562_v13 = vmul.f32 0.00390625, %v561_v11 }
 0x33b   : > { %v563_v14 = vadd.f32 1e-05, %v562_v13 }
 0x33d   : > { %988 = vrsqrt.f32 %v563_v14 }
 0x347   : > { %v989_v15 = vpop.eup %988 }
 0x348   : > { %v566_v16 = vmul.f32 %v989_v15, %v554_v4  ;;  %v565_v17 = vmul.f32 %v989_v15, %v553_v2 }
 0x34a   : > { %v1438_v18 = vmax.f32 %v566_v16, 0.0  ;;  %v1440_v21 = vmax.f32 %v565_v17, 0.0 }
 0x34c   : > { %571 = vrot.lane.b32.xlu0 %v1438_v18, %s1093_s8  ;;  %569 = vrot.lane.b32.xlu1 %v1440_v21, %s1093_s8  ;;  %v967_v22 = vpack.i.bf16 %v1438_v18, %v1440_v21 }
 0x350   : > { %968 = vrot.lane.b32.xlu0 %v967_v22, %s1095_s12  ;;  %575 = vrot.lane.b32.xlu1 %v1440_v21, %s1092_s20 }
 0x354   : > { %577 = vrot.lane.b32.xlu1 %v1438_v18, %s1092_s20  ;;  %s267_s20 = scalar_lea.vmem [#allocation5], %s863_s28  ;;  %s1026_s28 = sshll.u32 %s1097_s25, 4  ;;  %s1027_s28 = int_to_ptr.vmem [resolvable:$false] %s1026_s28 }
 0x355   : > { %s786_s8 = sshll.u32 %s267_s20, 4  ;;  %s1028_s15 = scalar_lea.vmem %s1027_s28, 256  ;;  %s1566_s8 = int_to_ptr.vmem [resolvable:$true] %s786_s8 }
 0x356   : > { %s1022_s14 = scalar_lea.vmem %s1566_s8, 128  ;;  %p1029_p7 = scmp.lt.s32.totalorder %s1566_s8, %s1027_s28 }
 0x357   : > { %p1023_p6 = scmp.ne.s32.totalorder %s1566_s8, %s1022_s14  ;;  %p1030_p10 = scmp.lt.s32.totalorder %s1028_s15, %s1022_s14 }
 0x358   : > { %973 = vrot.lane.b32.xlu1 %v967_v22, %s1094_s7 }
 0x359   : > { %p1024_p12 = pnand %p1023_p6, %p1631_p11  ;;  %p1031_p2 = por %p1030_p10, %p1029_p7 }
 0x35b   : > { %p1025_p13 = pneg %p1024_p12 }
 0x35d   : > { %p1032_p4 = pnand %p1031_p2, %p1025_p13 }
 0x3be   : > { %v570_v23 = vpop.permute.xlu1 %569  ;;  %v572_v25 = vpop.permute.xlu0 %571 }
 0x3bf   : > { %v573_v28 = vsel %vm369_vm3, %v570_v23, %v572_v25  ;;  %v574_v29 = vsel %vm369_vm3, %v572_v25, %v570_v23 }
 0x3c2   : > { %v576_v24 = vpop.permute.xlu1 %575  ;;  %v969_v30 = vpop.permute.xlu0 %968 }
 0x3c3   : > { %v971_v42 = vunpack.i.h.bf16 %v969_v30  ;;  %v970_v43 = vunpack.i.l.bf16 %v969_v30 }
 0x3c5   : > { %v605_v40 = vsel %vm387_vm8, %v970_v43, %v971_v42  ;;  %v606_v45 = vsel %vm387_vm8, %v971_v42, %v970_v43 }
 0x3c6   : > { %v578_v27 = vpop.permute.xlu1 %577 }
 0x3c7   : > { %v579_v31 = vsel %vm376_vm2, %v576_v24, %v578_v27  ;;  %v580_v32 = vsel %vm376_vm2, %v578_v27, %v576_v24 }
 0x3c8   : > { %v581_v33 = vsel %vm287_vm4, %v579_v31, %v574_v29  ;;  %v582_v34 = vsel %vm1294_vm5, %v580_v32, %v573_v28  ;;  %v1470_v36 = vsel %vm1320_vm6, %v573_v28, %v580_v32  ;;  %v1474_v37 = vsel %vm307_vm7, %v574_v29, %v579_v31 }
 0x3c9   : > { %v982_v35 = vpack.i.bf16 %v582_v34, %v581_v33  ;;  %v635_v49 = vrot.slane %v581_v33, 4  ;;  %v636_v52 = vrot.slane %v582_v34, 4  ;;  %v654_v23 = vrot.slane %v1470_v36, 4 }
 0x3ca   : > { %v974_v26 = vpop.permute.xlu1 %973  ;;  %v653_v24 = vrot.slane %v1474_v37, 4 }
 0x3cb   : > { %983 = vrot.lane.b32.xlu1 %v982_v35, %s1094_s7  ;;  %978 = vrot.lane.b32.xlu0 %v982_v35, %s1095_s12  ;;  %v976_v38 = vunpack.i.h.bf16 %v974_v26  ;;  %v975_v41 = vunpack.i.l.bf16 %v974_v26 }
 0x3cd   : > { %v611_v44 = vsel %vm394_vm9, %v975_v41, %v976_v38  ;;  %v612_v39 = vsel %vm394_vm9, %v976_v38, %v975_v41 }
 0x3ce   : > { %v614_v46 = vsel %vm1354_vm11, %v612_v39, %v605_v40  ;;  %v613_v48 = vsel %vm325_vm10, %v611_v44, %v606_v45  ;;  %v615_v57 = vsel %vm343_vm12, %v606_v45, %v611_v44  ;;  %v616_v59 = vsel %vm1370_vm13, %v605_v40, %v612_v39 }
 0x3cf   : > { %619 = vrot.lane.b32.xlu1 %v1470_v36, %s1095_s12  ;;  %617 = vrot.lane.b32.xlu0 %v1474_v37, %s1095_s12  ;;  %v642_v60 = vrot.slane %v614_v46, 4  ;;  %v641_v61 = vrot.slane %v613_v48, 4  ;;  %v647_v16 = vrot.slane %v615_v57, 4  ;;  %v648_v17 = vrot.slane %v616_v59, 4 }
 0x3d1   : > { %v662_v35 = vsel %vm457_vm14, %v1438_v18, %v648_v17 }
 0x3d3   : > { %625 = vrot.lane.b32.xlu1 %v1470_v36, %s1094_s7  ;;  %623 = vrot.lane.b32.xlu0 %v1474_v37, %s1094_s7  ;;  %v661_v37 = vsel %vm457_vm14, %v1440_v21, %v647_v16 }
 0x3d7   : > { %356 = vperm.xlu0 %966, %v353_v20  }
 0x43d   : > { %v979_v50 = vpop.permute.xlu0 %978  ;;  %v984_v51 = vpop.permute.xlu1 %983 }
 0x43e   : > { %v981_v7 = vunpack.i.h.bf16 %v979_v50  ;;  %v980_v54 = vunpack.i.l.bf16 %v979_v50  ;;  %v986_v55 = vunpack.i.h.bf16 %v984_v51  ;;  %v985_v56 = vunpack.i.l.bf16 %v984_v51 }
 0x440   : > { %v590_v62 = vsel %vm387_vm8, %v981_v7, %v980_v54  ;;  %v595_v63 = vsel %vm394_vm9, %v985_v56, %v986_v55  ;;  %v589_v0 = vsel %vm387_vm8, %v980_v54, %v981_v7  ;;  %v596_v1 = vsel %vm394_vm9, %v986_v55, %v985_v56 }
 0x441   : > { %v618_v2 = vpop.permute.xlu0 %617  ;;  %v620_v4 = vpop.permute.xlu1 %619  ;;  %v598_v5 = vsel %vm1354_vm11, %v596_v1, %v589_v0  ;;  %v600_v6 = vsel %vm1370_vm13, %v589_v0, %v596_v1  ;;  %v597_v8 = vsel %vm325_vm10, %v595_v63, %v590_v62  ;;  %v599_v9 = vsel %vm343_vm12, %v590_v62, %v595_v63 }
 0x442   : > { %v658_v10 = vsel %vm457_vm14, %v598_v5, %v636_v52  ;;  %v660_v11 = vsel %vm457_vm14, %v600_v6, %v642_v60  ;;  %v657_v14 = vsel %vm457_vm14, %v597_v8, %v635_v49  ;;  %v659_v15 = vsel %vm457_vm14, %v599_v9, %v641_v61 }
 0x443   : > { %v886_v13 = vpack.c.bf16 %v660_v11, %v658_v10  ;;  %v888_v22 = vpack.c.bf16 %v659_v15, %v657_v14  ;;  %v621_v28 = vsel %vm387_vm8, %v618_v2, %v620_v4  ;;  %v622_v29 = vsel %vm387_vm8, %v620_v4, %v618_v2 }
 0x445   : > { %v624_v25 = vpop.permute.xlu0 %623  ;;  %v626_v27 = vpop.permute.xlu1 %625  ;;  %887 = vmatprep.subr.bf16.mxu1 %v886_v13 }
 0x446   : > { %v627_v31 = vsel %vm394_vm9, %v624_v25, %v626_v27  ;;  %v628_v32 = vsel %vm394_vm9, %v626_v27, %v624_v25  ;;  %889 = vmatpush1.bf16.msra.mxu1 %v888_v22 }
 0x447   : > { %v629_v33 = vsel %vm325_vm10, %v627_v31, %v622_v29  ;;  %v630_v34 = vsel %vm1354_vm11, %v628_v32, %v621_v28  ;;  %v632_v47 = vsel %vm1370_vm13, %v621_v28, %v628_v32  ;;  %v631_v18 = vsel %vm343_vm12, %v622_v29, %v627_v31 }
 0x448   : > { %v664_v36 = vsel %vm457_vm14, %v630_v34, %v654_v23  ;;  %v663_v20 = vsel %vm457_vm14, %v629_v33, %v653_v24 }
 0x449   : > { %v890_v26 = vpack.c.bf16 %v664_v36, %v662_v35  ;;  %v892_v19 = vpack.c.bf16 %v663_v20, %v661_v37 }
 0x44b   : > { %891 = vmatprep.subr.bf16.mxu1 %v890_v26 }
 0x44c   : > { %893 = vmatpush1.bf16.msra.mxu1 %v892_v19 }
 0x44d   : > { %868 = vmatprep.subr.msk.mxu1 %vm457_vm14, %v632_v47 }
 0x450   : > { %869 = vmatpush1.msk.msra.mxu1 %vm457_vm14, %v631_v18 }
 0x451   : > { %870 = vmatmul.mubr.msk.f32.vlgmr.msra.gmra.mrb[0].mxu1 %vm466_vm15, %v346_v53 }
 0x456   : > { %v357_v21 = vpop.permute.xlu0 %356 }
 0x524   : > { %v740_v30 = vpop.f32.mrb[0].mxu1 }
 0x525   : > { %v741_v38 = vadd.f32 %v740_v30, %v357_v21  ;;  %v742_v41 = vpop.f32.mrb[1].mxu1 }
 0x526   : > { %v743_v42 = vadd.f32 %v742_v41, %v357_v21 }
 0x527   : > { %v745_v58 = vsel %vm457_vm14, %v741_v38, 0.0 }
 0x528   : > { %v746_v43 = vsel %vm457_vm14, %v743_v42, 0.0 }
 0x529   : > { %v747_v44 = vadd.f32 %v746_v43, %v745_v58 }
 0x52b   : > { %748 = vadd.xlane.f32.xlu1 %v747_v44 }
 0x5b8   : > { %v749_v39 = vpop.xlane.xlu1 %748 }
 0x5b9   : > { %v750_v40 = vmul.f32 0.00390625, %v749_v39 }
 0x5bb   : > { %v751_v12 = vsub.f32 %v741_v38, %v750_v40  ;;  %v752_v45 = vsub.f32 %v743_v42, %v750_v40 }
 0x5bd   : > { %v753_v46 = vmul.f32 %v751_v12, %v751_v12  ;;  %v754_v48 = vmul.f32 %v752_v45, %v752_v45 }
 0x5bf   : > { %v755_v49 = vsel %vm457_vm14, %v753_v46, 0.0  ;;  %v756_v50 = vsel %vm457_vm14, %v754_v48, 0.0 }
 0x5c0   : > { %v757_v51 = vadd.f32 %v756_v50, %v755_v49 }
 0x5c2   : > { %758 = vadd.xlane.f32.xlu0 %v757_v51 }
 0x64f   : > { %v759_v52 = vpop.xlane.xlu0 %758 }
 0x650   : > { %v760_v7 = vmul.f32 0.00390625, %v759_v52 }
 0x652   : > { %v761_v54 = vadd.f32 1e-05, %v760_v7 }
 0x654   : > { %990 = vrsqrt.f32 %v761_v54 }
 0x65e   : > { %v991_v55 = vpop.eup %990 }
 0x65f   : > { %v763_v56 = vmul.f32 %v991_v55, %v751_v12  ;;  %v764_v57 = vmul.f32 %v991_v55, %v752_v45 }
 0x661   : > { %v767_v59 = vcombine.low %v763_v56, %v764_v57 }
 0x663   : > { %v769_v60 = vadd.f32 %v767_v59, %v1250_v3 }
 0x665   : > { %770 = vst [vmem:[%s267_s20] sm:$0xff] %v769_v60 }
 0x666   : > { %1035 = shalt.err (!%p1032_p4)
}
 0x667   : > { %s1036_s26 = scalar_lea.hbm %s1564_s13, 128  ;;  %s1040_s19 = scalar_lea.hbm %s1614_s6, 256 }
 0x668   : > { %p1037_p5 = scmp.ne.s32.totalorder %s1564_s13, %s1036_s26  ;;  %p1041_p0 = scmp.lt.u32.totalorder %s1564_s13, %s1614_s6 }
 0x669   : > { %p1042_p1 = scmp.lt.u32.totalorder %s1040_s19, %s1036_s26  ;;  %p1044_p6 = scmp.lt.u32.totalorder %s1036_s26, %s1564_s13 }
 0x66a   : > { %p1038_p8 = pnand %p1037_p5, %p1631_p11 }
 0x66b   : > { %p1043_p3 = por %p1042_p1, %p1041_p0 }
 0x66c   : > { %p1039_p9 = pneg %p1038_p8 }
 0x66d   : > { %p1045_p12 = por %p1044_p6, %p1043_p3 }
 0x66f   : > { %p1046_p13 = pnand %p1045_p12, %p1039_p9 }
 0x671   : > { %1049 = shalt.err (!%p1046_p13)
}
 0x672   : > { %896 = dma.vmem_to_hbm [thread:$0]  (%p1631_p11), %s1566_s8, 128, %s1564_s13, %s772_s11  }
 0x673 PF: > { %s798_s20 = sand.u32 1, %s1076_s21   ;;  %p1632_p7 = scmp.ne.s32.totalorder %s1619_s10, 0 }
 0x674   : > { %p1633_p10 = scmp.ge.s32.totalorder %s1088_s24, 2  ;;  %s799_s7 = scalar_lea.sflag [#allocation4], %s798_s20 }
 0x676   : > { %p903_p2 = pnand %p1633_p10, %p1632_p7 }
 0x678   : > { %1071 = dma.done.wait (!%p903_p2), %s799_s7, 128  }
 0x679   : > { %1073 = vsyncadd (!%p903_p2), %s799_s7, 4294967168  ;;  %p19_p4 = scmp.ge.s32.totalorder %s1158_s27, 4   ;;  %s1634_s21 = smov %s1080_s22 }
 0x67a   : > { %s1635_s22 = smov %s1084_s23  ;;  %s1636_s23 = smov %s1170_s30 }
 0x67b   : > { %s1637_s24 = smov %s1158_s27  ;;  %21 = sbr.rel (!%p19_p4) target bundleno = 5 (0x5), region = 89 }
 0x682   :  { %804 = vsyncpa [#allocation3], 1 }
 0x683   :  { %806 = vsyncpa [#allocation3 + $0x1], 1 }
 0x684   :  { %807 = vsyncpa [#allocation4], 1 }
 0x685   :  { %809 = vsyncpa [#allocation4 + $0x1], 1 }

</bundles_post_ra>
